<compile_context>
chip_gen: v5e
topology: v5e:2x2
jax: 0.10.0
libtpu: 0.0.40
codegen_flags: <defaults>
</compile_context>

<pallas_src>
import jax
import jax.numpy as jnp
from jax import lax
from jax.experimental import pallas as pl
from jax.experimental.pallas import tpu as pltpu


MASK_VALUE = -1e30  # large finite negative: NaN-proof even for fully-padded rows


def _round_up(x, m):
    return (x + m - 1) // m * m


def _choose_blocks(L, block_attn, pass1_rows):
    """Pick (pass-1 row tile, attention tile, padded L)."""
    if L <= block_attn:
        blk2 = _round_up(L, 8)        # single tile == full (padded) sequence
    else:
        blk2 = block_attn             # multiple of 128 by construction
    Lp = _round_up(L, blk2)
    nblk = Lp // blk2
    m = max(1, min(nblk, max(1, pass1_rows // blk2)))
    while nblk % m != 0:              # pass-1 tile must divide Lp
        m -= 1
    return blk2 * m, blk2, Lp


def _derive_vmem_limit():
    cap = None
    try:
        info = pltpu.get_tpu_info()
        cap = int(getattr(info, "vmem_capacity_bytes", 0)) or None
    except Exception:
        cap = None
    if cap is None:
        cap = 64 << 20                # conservative: v7x physical VMEM
    # leave headroom for compiler-internal scratch; cap well under v5e/v6e 128MiB
    return int(max(32 << 20, min(cap - (16 << 20), 96 << 20)))


# --------------------------------------------------------------------------
# Pass 1: GroupNorm affine (precomputed scale/shift) + fused QKV projection
# --------------------------------------------------------------------------
def _qkv_proj_kernel(x_ref, scale_ref, shift_ref, wqkv_ref, bqkv_ref, qkv_ref):
    # GroupNorm folded to a single FMA per position.
    xn = x_ref[0] * scale_ref[0] + shift_ref[0]                    # (blk1, Cp) f32
    qkv = jnp.dot(xn.astype(jnp.bfloat16), wqkv_ref[...],
                  preferred_element_type=jnp.float32) + bqkv_ref[...]
    qkv_ref[0] = qkv.astype(jnp.bfloat16)                          # one lane-dense store


# --------------------------------------------------------------------------
# Pass 2: flash-style causal attention + proj_out + residual
#         (flattened lower-triangular grid via scalar-prefetched qi/ki maps)
# --------------------------------------------------------------------------
def _flash_attn_kernel(qi_map_ref, ki_map_ref,
                       q_ref, k_ref, v_ref, xres_ref, wp_ref, bp_ref,
                       o_ref, m_sc, l_sc, acc_sc):
    t = pl.program_id(1)
    qi = qi_map_ref[t]
    ki = ki_map_ref[t]

    @pl.when(ki == 0)
    def _init():
        m_sc[...] = jnp.full_like(m_sc[...], MASK_VALUE)
        l_sc[...] = jnp.zeros_like(l_sc[...])
        acc_sc[...] = jnp.zeros_like(acc_sc[...])

    def _scores():
        # Contract last dims directly -> no explicit k.T (no XLU transpose).
        # softmax scale is already folded into the q projection weights.
        return lax.dot_general(q_ref[0], k_ref[0], (((1,), (1,)), ((), ())),
                               preferred_element_type=jnp.float32)

    def _update(s):
        m_prev = m_sc[...]                                          # (blk, 1)
        m_new = jnp.maximum(m_prev, jnp.max(s, axis=-1, keepdims=True))
        alpha = jnp.exp(m_prev - m_new)
        p = jnp.exp(s - m_new)
        l_sc[...] = alpha * l_sc[...] + jnp.sum(p, axis=-1, keepdims=True)
        acc_sc[...] = alpha * acc_sc[...] + lax.dot_general(
            p.astype(jnp.bfloat16), v_ref[0], (((1,), (0,)), ((), ())),
            preferred_element_type=jnp.float32)
        m_sc[...] = m_new

    # Off-diagonal lower tiles: fully un-masked -> no iota / where work at all.
    @pl.when(ki < qi)
    def _off_diag():
        _update(_scores())

    # Diagonal tile: element-wise causal mask, then finalize (this is always
    # the last kv step for this q tile): normalize, proj_out, add residual.
    @pl.when(ki == qi)
    def _diag_and_finalize():
        s = _scores()
        rows = lax.broadcasted_iota(jnp.int32, s.shape, 0)
        cols = lax.broadcasted_iota(jnp.int32, s.shape, 1)
        _update(jnp.where(cols <= rows, s, MASK_VALUE))

        inv_l = pl.reciprocal(l_sc[...], approx=True)               # EUP slot
        attn = acc_sc[...] * inv_l                                  # (blk, Cp) f32
        h = lax.dot_general(attn.astype(jnp.bfloat16), wp_ref[...],
                            (((1,), (0,)), ((), ())),
                            preferred_element_type=jnp.float32) + bp_ref[...]
        o_ref[0] = xres_ref[0] + h


# --------------------------------------------------------------------------
# Wrapper
# --------------------------------------------------------------------------
def attn_block_pallas(x, params, *, num_groups=32, eps=1e-6,
                      block_attn=256, pass1_rows=512):
    """x: (B, C, T, H, W) float32, PyTorch NCTHW layout."""
    B, C, T, H, W = x.shape
    L = T * H * W
    G = num_groups
    assert C % G == 0
    Cg = C // G

    xf32 = x.astype(jnp.float32)

    # ---- GroupNorm stats: single fused E[x]/E[x^2] pass, folded to scale/shift ----
    xg = xf32.reshape(B, G, Cg * T * H * W)
    mu = jnp.mean(xg, axis=-1)                                       # (B, G)
    ms = jnp.mean(jnp.square(xg), axis=-1)                           # (B, G)
    inv = lax.rsqrt(jnp.maximum(ms - jnp.square(mu), 0.0) + eps)     # (B, G)
    gamma = params["gamma"].astype(jnp.float32)
    beta = params["beta"].astype(jnp.float32)
    scale_c = gamma[None, :] * jnp.repeat(inv, Cg, axis=1)           # (B, C)
    shift_c = beta[None, :] - jnp.repeat(mu * inv, Cg, axis=1) * gamma[None, :]

    # ---- NCTHW -> (B, L, C) channels-last ----
    xf = jnp.transpose(xf32, (0, 2, 3, 4, 1)).reshape(B, L, C)

    # ---- tile / padding selection ----
    Cp = _round_up(C, 128)
    blk1, blk2, Lp = _choose_blocks(L, block_attn, pass1_rows)
    nblk1 = Lp // blk1
    nblk2 = Lp // blk2

    if Cp == C and Lp == L:
        x_pad = xf                                                   # skip pad pass
    else:
        x_pad = jnp.zeros((B, Lp, Cp), jnp.float32).at[:, :L, :C].set(xf)

    if Cp == C:
        scale_pad = scale_c[:, None, :]
        shift_pad = shift_c[:, None, :]
    else:
        scale_pad = jnp.zeros((B, 1, Cp), jnp.float32).at[:, 0, :C].set(scale_c)
        shift_pad = jnp.zeros((B, 1, Cp), jnp.float32).at[:, 0, :C].set(shift_c)

    sm_scale = 1.0 / float(C) ** 0.5   # unpadded C; folded into q projection

    def pad_w(w):  # conv weight (C_out, C_in) -> (Cp, Cp) so that y = x @ W, W = w.T
        wt = w.astype(jnp.float32).T
        if Cp == C:
            return wt
        return jnp.zeros((Cp, Cp), jnp.float32).at[:C, :C].set(wt)

    def pad_b(b):
        bf = b.astype(jnp.float32)
        if Cp == C:
            return bf[None, :]
        return jnp.zeros((1, Cp), jnp.float32).at[0, :C].set(bf)

    wqkv = jnp.concatenate(
        [pad_w(params["wq"] * sm_scale), pad_w(params["wk"]), pad_w(params["wv"])],
        axis=1).astype(jnp.bfloat16)                                 # (Cp, 3Cp)
    bqkv = jnp.concatenate(
        [pad_b(params["bq"] * sm_scale), pad_b(params["bk"]), pad_b(params["bv"])],
        axis=1)                                                      # (1, 3Cp) f32
    w_proj = pad_w(params["wp"]).astype(jnp.bfloat16)                # (Cp, Cp)
    b_proj = pad_b(params["bp"])                                     # (1, Cp) f32

    vmem_limit = _derive_vmem_limit()

    # ---- Pass 1: GN-affine + fused QKV projection, single concatenated output ----
    qkv = pl.pallas_call(
        _qkv_proj_kernel,
        out_shape=jax.ShapeDtypeStruct((B, Lp, 3 * Cp), jnp.bfloat16),
        grid_spec=pltpu.PrefetchScalarGridSpec(
            num_scalar_prefetch=0,
            grid=(B, nblk1),
            in_specs=[
                pl.BlockSpec((1, blk1, Cp), lambda b, i: (b, i, 0)),
                pl.BlockSpec((1, 1, Cp), lambda b, i: (b, 0, 0)),
                pl.BlockSpec((1, 1, Cp), lambda b, i: (b, 0, 0)),
                pl.BlockSpec((Cp, 3 * Cp), lambda b, i: (0, 0)),
                pl.BlockSpec((1, 3 * Cp), lambda b, i: (0, 0)),
            ],
            out_specs=pl.BlockSpec((1, blk1, 3 * Cp), lambda b, i: (b, i, 0)),
        ),
        compiler_params=pltpu.CompilerParams(
            dimension_semantics=("parallel", "parallel"),
            vmem_limit_bytes=vmem_limit),
    )(x_pad, scale_pad, shift_pad, wqkv, bqkv)

    # ---- Pass 2: flash causal attention over flattened lower-triangular grid ----
    qi_list, ki_list = [], []
    for q_i in range(nblk2):
        for k_i in range(q_i + 1):     # ki runs 0..qi; diagonal is the last kv step
            qi_list.append(q_i)
            ki_list.append(k_i)
    n_tri = len(qi_list)
    qi_map = jnp.asarray(qi_list, dtype=jnp.int32)
    ki_map = jnp.asarray(ki_list, dtype=jnp.int32)

    # q/k/v come from the single concatenated QKV array via column-block index.
    q_spec = pl.BlockSpec((1, blk2, Cp), lambda b, t, qm, km: (b, qm[t], 0))
    k_spec = pl.BlockSpec((1, blk2, Cp), lambda b, t, qm, km: (b, km[t], 1))
    v_spec = pl.BlockSpec((1, blk2, Cp), lambda b, t, qm, km: (b, km[t], 2))
    xres_spec = pl.BlockSpec((1, blk2, Cp), lambda b, t, qm, km: (b, qm[t], 0))
    wp_spec = pl.BlockSpec((Cp, Cp), lambda b, t, qm, km: (0, 0))
    bp_spec = pl.BlockSpec((1, Cp), lambda b, t, qm, km: (0, 0))
    o_spec = pl.BlockSpec((1, blk2, Cp), lambda b, t, qm, km: (b, qm[t], 0))

    cost = pl.CostEstimate(
        flops=int(B * (2 * Lp * Lp * Cp + 2 * Lp * Cp * Cp)),
        transcendentals=int(B * Lp * Lp // 2),
        bytes_accessed=int(B * (nblk2 * Lp * Cp * 2 + Lp * Cp * (2 + 4 + 4))
                           + Cp * Cp * 2),
    )

    out_pad = pl.pallas_call(
        _flash_attn_kernel,
        out_shape=jax.ShapeDtypeStruct((B, Lp, Cp), jnp.float32),
        grid_spec=pltpu.PrefetchScalarGridSpec(
            num_scalar_prefetch=2,
            grid=(B, n_tri),
            in_specs=[q_spec, k_spec, v_spec, xres_spec, wp_spec, bp_spec],
            out_specs=o_spec,
            scratch_shapes=[
                pltpu.VMEM((blk2, 1), jnp.float32),    # running max m
                pltpu.VMEM((blk2, 1), jnp.float32),    # running sum l
                pltpu.VMEM((blk2, Cp), jnp.float32),   # f32 accumulator
            ]),
        compiler_params=pltpu.CompilerParams(
            dimension_semantics=("parallel", "arbitrary"),
            vmem_limit_bytes=vmem_limit),
        cost_estimate=cost,
    )(qi_map, ki_map, qkv, qkv, qkv, x_pad, w_proj, b_proj)

    out = out_pad[:, :L, :C]
    return jnp.transpose(out.reshape(B, T, H, W, C), (0, 4, 1, 2, 3)).astype(x.dtype)


# --------------------------------------------------------------------------
# Pure-JAX reference mirroring the PyTorch module semantics
# (1x1x1 conv q/k/v, scaled_dot_product_attention(is_causal=True), proj_out, residual)
# --------------------------------------------------------------------------
def attn_block_ref(x, params, *, num_groups=32, eps=1e-6):
    B, C, T, H, W = x.shape
    G, Cg = num_groups, C // num_groups
    xg = x.reshape(B, G, Cg, T, H, W)
    mu = xg.mean(axis=(2, 3, 4, 5), keepdims=True)
    var = ((xg - mu) ** 2).mean(axis=(2, 3, 4, 5), keepdims=True)
    xn = ((xg - mu) / jnp.sqrt(var + eps)).reshape(B, C, T, H, W)
    xn = xn * params["gamma"][None, :, None, None, None] + params["beta"][None, :, None, None, None]

    def proj(z, w, b):
        return jnp.einsum("oc,bcthw->bothw", w, z) + b[None, :, None, None, None]

    q = proj(xn, params["wq"], params["bq"])
    k = proj(xn, params["wk"], params["bk"])
    v = proj(xn, params["wv"], params["bv"])

    L = T * H * W
    to_seq = lambda z: jnp.transpose(z, (0, 2, 3, 4, 1)).reshape(B, L, C)
    qf, kf, vf = to_seq(q), to_seq(k), to_seq(v)
    scores = jnp.einsum("blc,bmc->blm", qf, kf) / jnp.sqrt(jnp.float32(C))
    mask = jnp.tril(jnp.ones((L, L), dtype=bool))
    scores = jnp.where(mask[None], scores, -jnp.inf)
    attn = jax.nn.softmax(scores, axis=-1)
    of = jnp.einsum("blm,bmc->blc", attn, vf)
    o = jnp.transpose(of.reshape(B, T, H, W, C), (0, 4, 1, 2, 3))
    h = proj(o, params["wp"], params["bp"])
    return x + h


if __name__ == "__main__":
    # GroupNorm(32, C) requires C % 32 == 0.  L = T*H*W = 512 with block_attn=256
    # exercises the triangular grid (3 tiles: 2 diagonal + 1 off-diagonal),
    # channel padding C=64 -> 128 lanes, and a pass-1 tile (512) larger than the
    # attention tile (256).
    B, C, T, H, W = 2, 64, 8, 8, 8

    key = jax.random.PRNGKey(0)
    ks = jax.random.split(key, 11)
    params = {
        "gamma": 1.0 + 0.1 * jax.random.normal(ks[0], (C,), jnp.float32),
        "beta": 0.1 * jax.random.normal(ks[1], (C,), jnp.float32),
        "wq": 0.1 * jax.random.normal(ks[2], (C, C), jnp.float32),
        "bq": 0.05 * jax.random.normal(ks[3], (C,), jnp.float32),
        "wk": 0.1 * jax.random.normal(ks[4], (C, C), jnp.float32),
        "bk": 0.05 * jax.random.normal(ks[5], (C,), jnp.float32),
        "wv": 0.1 * jax.random.normal(ks[6], (C, C), jnp.float32),
        "bv": 0.05 * jax.random.normal(ks[7], (C,), jnp.float32),
        "wp": 0.1 * jax.random.normal(ks[8], (C, C), jnp.float32),
        "bp": 0.05 * jax.random.normal(ks[9], (C,), jnp.float32),
    }
    x = jax.random.normal(ks[10], (B, C, T, H, W), jnp.float32)

    out = jax.block_until_ready(attn_block_pallas(x, params))
    ref = jax.block_until_ready(attn_block_ref(x, params))

    assert out.shape == (B, C, T, H, W)
    # bf16 MXU inputs (f32 accumulation) + EUP approx reciprocal: allow a few
    # percent of the output dynamic range; semantic bugs would be O(max|ref|).
    err = float(jnp.max(jnp.abs(out - ref)))
    tol = 3e-2 * float(jnp.max(jnp.abs(ref))) + 1e-3
    assert err < tol, (err, tol)

    print("KERNEL_OK")
</pallas_src>

<mosaic_0001>
module attributes {stable_mosaic.version = 11 : i64} {
  func.func @_qkv_proj_kernel(%arg0: i32, %arg1: i32, %arg2: memref<1x512x128xf32, #tpu.memory_space<vmem>>, %arg3: memref<1x1x128xf32, #tpu.memory_space<vmem>>, %arg4: memref<1x1x128xf32, #tpu.memory_space<vmem>>, %arg5: memref<128x384xbf16, #tpu.memory_space<vmem>>, %arg6: memref<1x384xf32, #tpu.memory_space<vmem>>, %arg7: memref<1x512x384xbf16, #tpu.memory_space<vmem>>) attributes {dimension_semantics = [#tpu.dimension_semantics<parallel>, #tpu.dimension_semantics<parallel>], iteration_bounds = array<i64: 2, 1>, scalar_prefetch = 0 : i64, scratch_operands = 0 : i64, tpu.core_type = #tpu.core_type<tc>, window_params = [{transform_indices = @transform_0, window_bounds = array<i64: 1, 512, 128>}, {transform_indices = @transform_1, window_bounds = array<i64: 1, 1, 128>}, {transform_indices = @transform_2, window_bounds = array<i64: 1, 1, 128>}, {pipeline_mode = #tpu.pipeline_mode<synchronous>, transform_indices = @transform_3, window_bounds = array<i64: 128, 384>}, {pipeline_mode = #tpu.pipeline_mode<synchronous>, transform_indices = @transform_4, window_bounds = array<i64: 1, 384>}, {transform_indices = @transform_5, window_bounds = array<i64: 1, 512, 384>}]} {
    %c0 = arith.constant 0 : index
    %c0_0 = arith.constant 0 : index
    %c0_1 = arith.constant 0 : index
    %0 = vector.load %arg2[%c0, %c0_0, %c0_1] : memref<1x512x128xf32, #tpu.memory_space<vmem>>, vector<1x512x128xf32>
    %1 = vector.shape_cast %0 : vector<1x512x128xf32> to vector<512x128xf32>
    %c0_2 = arith.constant 0 : index
    %c0_3 = arith.constant 0 : index
    %c0_4 = arith.constant 0 : index
    %2 = vector.load %arg3[%c0_2, %c0_3, %c0_4] : memref<1x1x128xf32, #tpu.memory_space<vmem>>, vector<1x1x128xf32>
    %3 = vector.shape_cast %2 : vector<1x1x128xf32> to vector<1x128xf32>
    %4 = vector.broadcast %3 : vector<1x128xf32> to vector<512x128xf32>
    %5 = arith.mulf %1, %4 : vector<512x128xf32>
    %c0_5 = arith.constant 0 : index
    %c0_6 = arith.constant 0 : index
    %c0_7 = arith.constant 0 : index
    %6 = vector.load %arg4[%c0_5, %c0_6, %c0_7] : memref<1x1x128xf32, #tpu.memory_space<vmem>>, vector<1x1x128xf32>
    %7 = vector.shape_cast %6 : vector<1x1x128xf32> to vector<1x128xf32>
    %8 = vector.broadcast %7 : vector<1x128xf32> to vector<512x128xf32>
    %9 = arith.addf %5, %8 : vector<512x128xf32>
    %10 = arith.truncf %9 : vector<512x128xf32> to vector<512x128xbf16>
    %c0_8 = arith.constant 0 : index
    %c0_9 = arith.constant 0 : index
    %11 = vector.load %arg5[%c0_8, %c0_9] : memref<128x384xbf16, #tpu.memory_space<vmem>>, vector<128x384xbf16>
    %cst = arith.constant dense<0.000000e+00> : vector<512x384xf32>
    %12 = tpu.matmul %10, %11, %cst {dimension_numbers = #tpu.dot_dimension_numbers<[1], [0], [0], [1], [0, 0, 1, 1], [], []>} : vector<512x128xbf16>, vector<128x384xbf16>, vector<512x384xf32> -> vector<512x384xf32>
    %c0_10 = arith.constant 0 : index
    %c0_11 = arith.constant 0 : index
    %13 = vector.load %arg6[%c0_10, %c0_11] : memref<1x384xf32, #tpu.memory_space<vmem>>, vector<1x384xf32>
    %14 = vector.broadcast %13 : vector<1x384xf32> to vector<512x384xf32>
    %15 = arith.addf %12, %14 : vector<512x384xf32>
    %16 = arith.truncf %15 : vector<512x384xf32> to vector<512x384xbf16>
    %c0_12 = arith.constant 0 : index
    %c0_13 = arith.constant 0 : index
    %c0_14 = arith.constant 0 : index
    %17 = vector.load %arg7[%c0_12, %c0_13, %c0_14] : memref<1x512x384xbf16, #tpu.memory_space<vmem>>, vector<1x512x384xbf16>
    %18 = vector.shape_cast %17 : vector<1x512x384xbf16> to vector<512x384xbf16>
    %19 = vector.shape_cast %16 : vector<512x384xbf16> to vector<1x512x384xbf16>
    tpu.vector_store %arg7[%c0_12, %c0_13, %c0_14], %19 {strides = array<i32>} : memref<1x512x384xbf16, #tpu.memory_space<vmem>>, vector<1x512x384xbf16>,
    return
  }
  func.func @transform_0(%arg0: i32, %arg1: i32) -> (i32, i32, i32) {
    %c0_i32 = arith.constant 0 : i32
    %c0_i32_0 = arith.constant 0 : i32
    return %arg0, %arg1, %c0_i32 : i32, i32, i32
  }
  func.func @transform_1(%arg0: i32, %arg1: i32) -> (i32, i32, i32) {
    %c0_i32 = arith.constant 0 : i32
    %c0_i32_0 = arith.constant 0 : i32
    %c0_i32_1 = arith.constant 0 : i32
    return %arg0, %c0_i32, %c0_i32_0 : i32, i32, i32
  }
  func.func @transform_2(%arg0: i32, %arg1: i32) -> (i32, i32, i32) {
    %c0_i32 = arith.constant 0 : i32
    %c0_i32_0 = arith.constant 0 : i32
    %c0_i32_1 = arith.constant 0 : i32
    return %arg0, %c0_i32, %c0_i32_0 : i32, i32, i32
  }
  func.func @transform_3(%arg0: i32, %arg1: i32) -> (i32, i32) {
    %c0_i32 = arith.constant 0 : i32
    %c0_i32_0 = arith.constant 0 : i32
    %c0_i32_1 = arith.constant 0 : i32
    return %c0_i32, %c0_i32_0 : i32, i32
  }
  func.func @transform_4(%arg0: i32, %arg1: i32) -> (i32, i32) {
    %c0_i32 = arith.constant 0 : i32
    %c0_i32_0 = arith.constant 0 : i32
    %c0_i32_1 = arith.constant 0 : i32
    return %c0_i32, %c0_i32_0 : i32, i32
  }
  func.func @transform_5(%arg0: i32, %arg1: i32) -> (i32, i32, i32) {
    %c0_i32 = arith.constant 0 : i32
    %c0_i32_0 = arith.constant 0 : i32
    return %arg0, %arg1, %c0_i32 : i32, i32, i32
  }
}

</mosaic_0001>

<bundles_post_ra>
// kernel: tpu_custom_call.1
= control target key start
LH: loop header
LB: loop body
LE: loop exit
PB: predicated region body
PF: predicated region fallthrough
CT: control target
= control target key end

     0   :  { %s3032_s0 = inlined_call_operand.hbm [shape: f32[2,512,128], index: 0, kind: input, shape index: {}]   ;;  %s3033_s1 = inlined_call_operand.hbm [shape: f32[2,1,128], index: 1, kind: input, shape index: {}]   ;;  %s3034_s2 = inlined_call_operand.hbm [shape: f32[2,1,128], index: 2, kind: input, shape index: {}]   ;;  %s3035_s3 = inlined_call_operand.hbm [shape: bf16[128,384], index: 3, kind: input, shape index: {}]   ;;  %s3036_s4 = inlined_call_operand.vmem [shape: f32[1,384], index: 4, kind: input, shape index: {}]   ;;  %s3037_s5 = inlined_call_operand.hbm [shape: bf16[2,512,384], index: 5, kind: output, shape index: {}]  }
   0x1   :  { %3044 = sst [smem:[#allocation21_spill]] %s3033_s1 }
   0x2   :  { %3045 = sst [smem:[#allocation22_spill]] %s3035_s3 }
   0x3   :  { %10 = vsyncpa [#allocation3], 0 }
   0x4   :  { %12 = vsyncpa [#allocation3 + $0x1], 0 }
   0x5   :  { %13 = vsyncpa [#allocation6], 0 }
   0x6   :  { %15 = vsyncpa [#allocation6 + $0x1], 0 }
   0x7   :  { %16 = vsyncpa [#allocation9], 0 }
   0x8   :  { %17 = vsyncpa [#allocation4], 0 }
   0x9   :  { %19 = vsyncpa [#allocation4 + $0x1], 0  ;;  %s2166_s18 = smov 0   ;;  %s2168_s19 = smov 0  }
   0xa   :  { %s2170_s20 = smov 0   ;;  %s2172_s21 = smov 0  }
   0xb   :  { %s2174_s22 = smov 0   ;;  %s2176_s23 = smov 0  }
   0xc LB: > { %3046 = sst [smem:[#allocation15_spill]] %s2107_s18  ;;  %s2197_s24 = sadd.s32 4294967295, %s2127_s23   ;;  %s2127_s23 = sphi %s2176_s23, %s25_s23   ;;  %s2123_s22 = sphi %s2174_s22, %s3068_s22   ;;  %s2119_s21 = sphi %s2172_s21, %s3067_s21   ;;  %s2115_s20 = sphi %s2170_s20, %s3063_s20   ;;  %s2111_s19 = sphi %s2168_s19, %s3066_s19   ;;  %s2107_s18 = sphi %s2166_s18, %s3065_s18  }
   0xd   : > { %3047 = sst [smem:[#allocation16_spill]] %s2115_s20  ;;  %s1664_s25 = sadd.s32 4294967294, %s2127_s23  }
   0xe   : > { %3048 = sst [smem:[#allocation17_spill]] %s2127_s23  ;;  %s37_s26 = sadd.s32 1, %s2123_s22 }
   0xf   : > { %s46_s27 = sadd.s32 1, %s2115_s20  ;;  %p39_p0 = scmp.ge.s32.totalorder %s37_s26, 2 }
  0x10   : > { %p53_p1 = scmp.ne.s32.totalorder %s2115_s20, %s2111_s19  ;;  %p54_p2 = scmp.eq.s32.totalorder %s2127_s23, 0 }
  0x11   : > { %p59_p3 = scmp.ne.s32.totalorder %s2111_s19, %s2107_s18  ;;  %s3070_s26 = smov (%p39_p0, %s37_s26), 0 }
  0x12   : > { %3049 = sst [smem:[#allocation18_spill]] %s3070_s26  ;;  %p55_p4 = por %p54_p2, %p53_p1 }
  0x13   : > { %p179_p5 = scmp.eq.s32.totalorder %s2197_s24, 1  ;;  %s41_s28 = ssub.s32 %s2123_s22, %s3070_s26 }
  0x14   : > { %p185_p6 = scmp.eq.s32.totalorder %s1664_s25, 1  ;;  %p44_p7 = scmp.eq.s32.totalorder %s41_s28, 0 }
  0x15   : > { %p2212_p8 = por %p179_p5, %p53_p1  ;;  %p1667_p10 = scmp.ge.s32.totalorder %s2127_s23, 2 }
  0x16   : > { %p2219_p9 = por %p185_p6, %p59_p3  ;;  %p1855_p11 = scmp.lt.s32.totalorder %s2127_s23, 2 }
  0x17   : > { %s2224_s6 = scalar_select %p44_p7, %s2115_s20, %s46_s27  }
  0x18   : > { %s3051_s30 = scalar_select %p2219_p9, 1, 0 }
  0x19   : > { %3053 = sst [smem:[#allocation20_spill]] %s2224_s6  ;;  %s2229_s7 = sand.u32 1, %s2115_s20  }
  0x1a   : > { %3052 = sst [smem:[#allocation19_spill]] %s3051_s30  ;;  %s246_s8 = sand.u32 1, %s2127_s23  }
  0x1b   : > { %p2232_p12 = pnand %p1855_p11, %p55_p4  ;;  %s3055_s1 = sld [smem:[#allocation21_spill]] }
  0x1c   : > { %s249_s14 = scalar_lea.vmem [#allocation5], %s2229_s7  ;;  %s2241_s16 = scalar_lea.sflag [#allocation6], %s246_s8 }
  0x1d   : > { %s256_s15 = sshll.u32 %s249_s14, 4  ;;  %p60_p13 = scmp.eq.s32.totalorder %s2197_s24, 0  ;;  %s257_s15 = int_to_ptr.vmem [resolvable:$true] %s256_s15 }
  0x1e   : > { %p1665_p0 = scmp.ge.s32.totalorder %s2127_s23, 1  ;;  %p192_p1 = scmp.lt.s32.totalorder %s2127_s23, 3 }
  0x1f   : > { %p2254_p2 = por %p60_p13, %p59_p3  ;;  %s3057_s3 = sld [smem:[#allocation22_spill]] }
  0x20   : > { %p2261_p4 = pnand %p1665_p0, %p192_p1  ;;  %s2129_s8 = smov [#allocation8]  }
  0x21   : > { %s252_s12 = scalar_lea.hbm %s3055_s1, %s2123_s22  ;;  %s205_s11 = sshll.u32 %s2129_s8, 4  ;;  %s206_s11 = int_to_ptr.vmem [resolvable:$true] %s205_s11 }
  0x22   : > { %s254_s13 = sshll.u32 %s252_s12, 4  ;;  %p1836_p5 = pneg %p2261_p4  ;;  %s255_s13 = int_to_ptr.hbm [resolvable:$true] %s254_s13 }
  0x23   : > { %1846 = dma.hbm_to_vmem [thread:$0]  (!%p2232_p12), %s255_s13, 16, %s257_s15, %s2241_s16  }
  0x24   : > { %p1837_p3 = pnand %p1836_p5, %p60_p13  ;;  %s1668_s12 = sshll.u32 %s2229_s7, 9 }
  0x25   : > { %s203_s28 = sshll.u32 %s3057_s3, 4  ;;  %s1773_s13 = sshll.u32 %s2123_s22, 9  ;;  %s204_s28 = int_to_ptr.hbm [resolvable:$true] %s203_s28 }
  0x26   : > { %s2130_s14 = smov 192   ;;  %s2131_s15 = smov 12  }
  0x27   : > { %1839 = dma.hbm_to_vmem [thread:$0]  (!%p1837_p3), %s204_s28, 3072, %s206_s11, [#allocation9], %s2130_s14, %s2130_s14, %s2131_s15  }
  0x28   : > { %s233_s1 = scalar_lea.hbm %s3032_s0, %s1773_s13  ;;  %s226_s3 = scalar_lea.vmem [#allocation2], %s1668_s12 }
  0x29   : > { %s236_s26 = sshll.u32 %s226_s3, 4  ;;  %s234_s8 = sshll.u32 %s233_s1, 4  ;;  %s237_s26 = int_to_ptr.vmem [resolvable:$true] %s236_s26  ;;  %s235_s8 = int_to_ptr.hbm [resolvable:$true] %s234_s8 }
  0x2a   : > { %s223_s6 = scalar_lea.sflag [#allocation3], %s2229_s7  ;;  %s2132_s20 = smov 128  }
  0x2b   : > { %s2133_s23 = smov 8   ;;  %s269_s28 = scalar_lea.hbm %s3034_s2, %s2123_s22 }
  0x2c   : > { %1843 = dma.hbm_to_vmem [thread:$0]  (!%p2232_p12), %s235_s8, 8192, %s237_s26, %s223_s6, %s2132_s20, %s2132_s20, %s2133_s23  }
  0x2d   : > { %s266_s11 = scalar_lea.vmem [#allocation7], %s2229_s7  ;;  %s271_s15 = sshll.u32 %s269_s28, 4  ;;  %s272_s15 = int_to_ptr.hbm [resolvable:$true] %s271_s15 }
  0x2e   : > { %s273_s14 = sshll.u32 %s266_s11, 4  ;;  %282 = sbr.rel (%p2261_p4) target bundleno = 609 (0x261), region = 40  ;;  %s274_s14 = int_to_ptr.vmem [resolvable:$true] %s273_s14 }
  0x2f   : > { %1849 = dma.hbm_to_vmem [thread:$0]  (!%p2232_p12), %s272_s15, 16, %s274_s14, %s2241_s16  }
  0x30   : > { %s2288_s1 = sand.u32 (!%p2261_p4), 1, %s2111_s19  }
  0x31   : > { %s1672_s3 = sshll.u32 (!%p2261_p4), %s2288_s1, 9  ;;  %s285_s20 = scalar_lea.sflag (!%p2261_p4), [#allocation3], %s2288_s1 }
  0x32   : > { %s2292_s18 = scalar_lea.vmem (!%p2261_p4), [#allocation2], %s1672_s3 }
  0x33   : > { %2090 = dma.done.wait (%p2254_p2), %s285_s20, 8192  }
  0x34   : > { %2092 = vsyncadd (%p2254_p2), %s285_s20, 4294959104  ;;  %s294_s23 = sand.u32 1, %s2197_s24   ;;  %s297_s30 = scalar_lea.vmem [#allocation5], %s2288_s1 }
  0x35   : > { %s295_s26 = scalar_lea.sflag [#allocation6], %s294_s23 }
  0x36   : > { %2094 = dma.done.wait (%p2254_p2), %s295_s26, 32  }
  0x37   : > { %2096 = vsyncadd (%p2254_p2), %s295_s26, 4294967264  ;;  %s306_s6 = scalar_lea.vmem [#allocation7], %s2288_s1 }
  0x38   : > { %2098 = dma.done.wait (%p60_p13), [#allocation9], 3072  }
  0x39   : > { %2100 = vsyncadd (%p60_p13), [#allocation9], 4294964224  ;;  %v1760_v0 = vld [vmem:[#allocation8 + $0xa8] sm:$0xf]  ;;  %v1796_v1 = vld [vmem:[#allocation8 + $0xb0] sm:$0xf0] }
  0x3a   : > { %v1795_v2 = vld [vmem:[#allocation8 + $0xac] sm:$0xf]  ;;  %v1761_v3 = vor.u32 %v1796_v1, %v1760_v0  ;;  %v1762_v4 = vld [vmem:[#allocation8 + $0xb4] sm:$0xf0]  ;;  %v1768_v5 = vld [vmem:[#allocation8 + $0xb0] sm:$0xf] }
  0x3b   : > { %v1797_v6 = vld [vmem:[#allocation8 + $0xb8] sm:$0xf0]  ;;  %v2309_v7 = vor.u32 %v1795_v2, %v1762_v4  ;;  %v1748_v9 = vld [vmem:[#allocation8 + $0x90] sm:$0xf]  ;;  %v1792_v11 = vld [vmem:[#allocation8 + $0x94] sm:$0xf] }
  0x3c   : > { %v2311_v8 = vor.u32 %v1797_v6, %v1768_v5  ;;  %v1793_v10 = vld [vmem:[#allocation8 + $0x98] sm:$0xf0]  ;;  %749 = vmatpush.bf16.msra.mxu0 %v1761_v3  ;;  %1798 = vmatpush.bf16.msra.mxu3 %v1761_v3  ;;  %v1750_v13 = vld [vmem:[#allocation8 + $0x9c] sm:$0xf0]  ;;  %v1756_v14 = vld [vmem:[#allocation8 + $0x98] sm:$0xf] }
  0x3d   : > { %v1749_v12 = vor.u32 %v1793_v10, %v1748_v9  ;;  %v1794_v15 = vld [vmem:[#allocation8 + $0xa0] sm:$0xf0]  ;;  %918 = vmatpush.bf16.msra.mxu1 %v2309_v7  ;;  %v2315_v16 = vor.u32 %v1792_v11, %v1750_v13  ;;  %v1736_v18 = vld [vmem:[#allocation8 + $0x78] sm:$0xf]  ;;  %v1789_v20 = vld [vmem:[#allocation8 + $0x7c] sm:$0xf] }
  0x3e   : > { %1087 = vmatpush.bf16.msra.mxu2 %v2311_v8  ;;  %v2317_v17 = vor.u32 %v1794_v15, %v1756_v14  ;;  %v1790_v19 = vld [vmem:[#allocation8 + $0x80] sm:$0xf0]  ;;  %v1738_v21 = vld [vmem:[#allocation8 + $0x84] sm:$0xf0]  ;;  %v1744_v22 = vld [vmem:[#allocation8 + $0x80] sm:$0xf] }
  0x3f   : > { %v1791_v23 = vld [vmem:[#allocation8 + $0x88] sm:$0xf0]  ;;  %v1737_v24 = vor.u32 %v1790_v19, %v1736_v18  ;;  %v2321_v25 = vor.u32 %v1789_v20, %v1738_v21  ;;  %v1724_v27 = vld [vmem:[#allocation8 + $0x60] sm:$0xf]  ;;  %v1786_v29 = vld [vmem:[#allocation8 + $0x64] sm:$0xf] }
  0x40   : > { %750 = vmatpush.bf16.msra.mxu0 %v1749_v12  ;;  %1799 = vmatpush.bf16.msra.mxu3 %v1749_v12  ;;  %v2323_v26 = vor.u32 %v1791_v23, %v1744_v22  ;;  %v1787_v28 = vld [vmem:[#allocation8 + $0x68] sm:$0xf0]  ;;  %v1726_v30 = vld [vmem:[#allocation8 + $0x6c] sm:$0xf0]  ;;  %v1732_v31 = vld [vmem:[#allocation8 + $0x68] sm:$0xf] }
  0x41   : > { %919 = vmatpush.bf16.msra.mxu1 %v2315_v16  ;;  %v1788_v32 = vld [vmem:[#allocation8 + $0x70] sm:$0xf0]  ;;  %v1725_v33 = vor.u32 %v1787_v28, %v1724_v27  ;;  %v2327_v34 = vor.u32 %v1786_v29, %v1726_v30  ;;  %v1712_v36 = vld [vmem:[#allocation8 + $0x48] sm:$0xf]  ;;  %v1783_v38 = vld [vmem:[#allocation8 + $0x4c] sm:$0xf] }
  0x42   : > { %1088 = vmatpush.bf16.msra.mxu2 %v2317_v17  ;;  %v2329_v35 = vor.u32 %v1788_v32, %v1732_v31  ;;  %v1784_v37 = vld [vmem:[#allocation8 + $0x50] sm:$0xf0]  ;;  %v1714_v39 = vld [vmem:[#allocation8 + $0x54] sm:$0xf0]  ;;  %v1720_v40 = vld [vmem:[#allocation8 + $0x50] sm:$0xf] }
  0x43   : > { %v1785_v41 = vld [vmem:[#allocation8 + $0x58] sm:$0xf0]  ;;  %v1713_v42 = vor.u32 %v1784_v37, %v1712_v36  ;;  %v1700_v43 = vld [vmem:[#allocation8 + $0x30] sm:$0xf]  ;;  %v2333_v45 = vor.u32 %v1783_v38, %v1714_v39  ;;  %v1780_v47 = vld [vmem:[#allocation8 + $0x34] sm:$0xf] }
  0x44   : > { %751 = vmatpush.bf16.msra.mxu0 %v1737_v24  ;;  %1800 = vmatpush.bf16.msra.mxu3 %v1737_v24  ;;  %v1781_v44 = vld [vmem:[#allocation8 + $0x38] sm:$0xf0]  ;;  %v2335_v46 = vor.u32 %v1785_v41, %v1720_v40  ;;  %v1702_v48 = vld [vmem:[#allocation8 + $0x3c] sm:$0xf0]  ;;  %v1708_v49 = vld [vmem:[#allocation8 + $0x38] sm:$0xf] }
  0x45   : > { %920 = vmatpush.bf16.msra.mxu1 %v2321_v25  ;;  %v1782_v50 = vld [vmem:[#allocation8 + $0x40] sm:$0xf0]  ;;  %v349_v51 = vld [vmem:[%s2292_s18] sm:$0xff]  ;;  %v1701_v53 = vor.u32 %v1781_v44, %v1700_v43  ;;  %v2347_v57 = vor.u32 %v1780_v47, %v1702_v48  ;;  %v1688_v59 = vld [vmem:[#allocation8 + $0x18] sm:$0xf]  ;;  %s1822_s9 = smul.u32 768, %s2288_s1 }
  0x46   : > { %1089 = vmatpush.bf16.msra.mxu2 %v2323_v26  ;;  %v2340_v52 = vld [vmem:[%s297_s30] ss:$0 sm:$0xff]  ;;  %v350_v54 = vld [vmem:[%s2292_s18 + $0x8] sm:$0xff]  ;;  %v2349_v58 = vor.u32 %v1782_v50, %v1708_v49  ;;  %v1696_v63 = vld [vmem:[#allocation8 + $0x20] sm:$0xf]  ;;  %s1823_s17 = smul.u32 768, %s2119_s21 }
  0x47   : > { %v397_v55 = vld [vmem:[%s2292_s18 + $0x180] sm:$0xff]  ;;  %v398_v56 = vld [vmem:[%s2292_s18 + $0x188] sm:$0xff]  ;;  %v1779_v0 = vld [vmem:[#allocation8 + $0x28] sm:$0xf0]  ;;  %v417_v1 = vmul.f32 %v2340_v52, %v349_v51  ;;  %v418_v2 = vmul.f32 %v2340_v52, %v350_v54  ;;  %s2514_s16 = scalar_lea.vmem [#allocation10], %s1822_s9  ;;  %s1513_s27 = scalar_lea.sflag [#allocation4], %s2288_s1 }
  0x48   : > { %752 = vmatpush.bf16.msra.mxu0 %v1725_v33  ;;  %1801 = vmatpush.bf16.msra.mxu3 %v1725_v33  ;;  %v1778_v60 = vld [vmem:[#allocation8 + $0x20] sm:$0xf0]  ;;  %v1777_v61 = vld [vmem:[#allocation8 + $0x1c] sm:$0xf]  ;;  %v1690_v62 = vld [vmem:[#allocation8 + $0x24] sm:$0xf0]  ;;  %v465_v4 = vmul.f32 %v2340_v52, %v397_v55  ;;  %v466_v5 = vmul.f32 %v2340_v52, %v398_v56  ;;  %v2361_v10 = vor.u32 %v1779_v0, %v1696_v63  ;;  %s1527_s13 = scalar_lea.hbm %s3037_s5, %s1823_s17 }
  0x49   : > { %921 = vmatpush.bf16.msra.mxu1 %v2327_v34  ;;  %v2355_v3 = vld [vmem:[%s306_s6] ss:$0 sm:$0xff]  ;;  %v1689_v6 = vor.u32 %v1778_v60, %v1688_v59  ;;  %v1693_v9 = vor.u32 %v1777_v61, %v1690_v62  ;;  %v1676_v11 = vld [vmem:[#allocation8] sm:$0xf]  ;;  %v1775_v12 = vld [vmem:[#allocation8 + $0x8] sm:$0xf0] }
  0x4a   : > { %1090 = vmatpush.bf16.msra.mxu2 %v2329_v35  ;;  %v1774_v13 = vld [vmem:[#allocation8 + $0x4] sm:$0xf]  ;;  %v1678_v14 = vld [vmem:[#allocation8 + $0xc] sm:$0xf0]  ;;  %v1684_v15 = vld [vmem:[#allocation8 + $0x8] sm:$0xf]  ;;  %v485_v19 = vadd.f32 %v2355_v3, %v417_v1  ;;  %v486_v20 = vadd.f32 %v2355_v3, %v418_v2  ;;  %v533_v21 = vadd.f32 %v2355_v3, %v465_v4  ;;  %v534_v22 = vadd.f32 %v2355_v3, %v466_v5 }
  0x4b   : > { %v1776_v18 = vld [vmem:[#allocation8 + $0x10] sm:$0xf0]  ;;  %v1677_v23 = vor.u32 %v1775_v12, %v1676_v11  ;;  %v1681_v24 = vor.u32 %v1774_v13, %v1678_v14  ;;  %v351_v30 = vld [vmem:[%s2292_s18 + $0x10] sm:$0xff]  ;;  %v354_v44 = vld [vmem:[%s2292_s18 + $0x28] sm:$0xff]  ;;  %s1528_s21 = sshll.u32 %s2514_s16, 4  ;;  %s1530_s25 = sshll.u32 %s1527_s13, 4  ;;  %s1529_s21 = int_to_ptr.vmem [resolvable:$true] %s1528_s21  ;;  %s1531_s25 = int_to_ptr.hbm [resolvable:$true] %s1530_s25 }
  0x4c   : > { %753 = vmatpush.bf16.msra.mxu0 %v1713_v42  ;;  %1802 = vmatpush.bf16.msra.mxu3 %v1713_v42  ;;  %v2368_v27 = vor.u32 %v1776_v18, %v1684_v15  ;;  %v549_v28 = vpack.c.bf16 %v486_v20, %v485_v19  ;;  %v2370_v29 = vpack.c.bf16 %v534_v22, %v533_v21  ;;  %v352_v31 = vld [vmem:[%s2292_s18 + $0x18] sm:$0xff]  ;;  %v399_v32 = vld [vmem:[%s2292_s18 + $0x190] sm:$0xff]  ;;  %v401_v47 = vld [vmem:[%s2292_s18 + $0x1a0] sm:$0xff]  ;;  %s2051_s8 = sshra.s32 %s1531_s25, 4  ;;  %s2057_s15 = scalar_lea.hbm %s3037_s5, 1536  ;;  %s2052_s8 = int_to_ptr.hbm [resolvable:$true] %s2051_s8 }
  0x4d   : > { %922 = vmatpush.bf16.msra.mxu1 %v2333_v45  ;;  %v400_v33 = vld [vmem:[%s2292_s18 + $0x198] sm:$0xff]  ;;  %v419_v36 = vmul.f32 %v2340_v52, %v351_v30  ;;  %v420_v37 = vmul.f32 %v2340_v52, %v352_v31  ;;  %v467_v38 = vmul.f32 %v2340_v52, %v399_v32  ;;  %v402_v48 = vld [vmem:[%s2292_s18 + $0x1a8] sm:$0xff]  ;;  %v469_v50 = vmul.f32 %v2340_v52, %v401_v47  ;;  %v355_v59 = vld [vmem:[%s2292_s18 + $0x30] sm:$0xff]  ;;  %s2053_s28 = scalar_lea.hbm %s2052_s8, 768  ;;  %p2058_p12 = scmp.lt.s32.totalorder %s2052_s8, %s3037_s5 }
  0x4e   : > { %1091 = vmatpush.bf16.msra.mxu2 %v2335_v46  ;;  %v356_v60 = vld [vmem:[%s2292_s18 + $0x38] sm:$0xff]  ;;  %v403_v61 = vld [vmem:[%s2292_s18 + $0x1b0] sm:$0xff]  ;;  %v423_v63 = vmul.f32 %v2340_v52, %v355_v59  ;;  %v358_v11 = vld [vmem:[%s2292_s18 + $0x48] sm:$0xff]  ;;  %p2054_p6 = scmp.ne.s32.totalorder %s2052_s8, %s2053_s28  ;;  %p2059_p13 = scmp.lt.s32.totalorder %s2057_s15, %s2053_s28 }
  0x4f   : > { %v487_v39 = vadd.f32 %v2355_v3, %v419_v36  ;;  %v488_v40 = vadd.f32 %v2355_v3, %v420_v37  ;;  %v537_v54 = vadd.f32 %v2355_v3, %v469_v50  ;;  %v404_v62 = vld [vmem:[%s2292_s18 + $0x1b8] sm:$0xff]  ;;  %v424_v0 = vmul.f32 %v2340_v52, %v356_v60  ;;  %v405_v12 = vld [vmem:[%s2292_s18 + $0x1c0] sm:$0xff]  ;;  %v406_v13 = vld [vmem:[%s2292_s18 + $0x1c8] sm:$0xff] }
  0x50   : > { %754 = vmatpush.bf16.msra.mxu0 %v1701_v53  ;;  %1803 = vmatpush.bf16.msra.mxu3 %v1701_v53  ;;  %v471_v1 = vmul.f32 %v2340_v52, %v403_v61  ;;  %v491_v2 = vadd.f32 %v2355_v3, %v423_v63  ;;  %v473_v15 = vmul.f32 %v2340_v52, %v405_v12  ;;  %v412_v59 = vld [vmem:[%s2292_s18 + $0x1f8] sm:$0xff]  ;;  %v613_v12 = vld [vmem:[%s3036_s4] sm:$0x7]  ;;  %p2055_p7 = pnand %p2054_p6, %p2212_p8  ;;  %p2060_p0 = por %p2059_p13, %p2058_p12 }
  0x51   : > { %923 = vmatpush.bf16.msra.mxu1 %v2347_v57  ;;  %v550_v42 = vpack.c.bf16 %v488_v40, %v487_v39  ;;  %v492_v4 = vadd.f32 %v2355_v3, %v424_v0  ;;  %v361_v40 = vld [vmem:[%s2292_s18 + $0x60] sm:$0xff]  ;;  %v480_v63 = vmul.f32 %v2340_v52, %v412_v59 }
  0x52   : > { %1092 = vmatpush.bf16.msra.mxu2 %v2349_v58  ;;  %v541_v20 = vadd.f32 %v2355_v3, %v473_v15  ;;  %v2504_v15 = vperm.slane %v613_v12, 1  ;;  %p2056_p11 = pneg %p2055_p7 }
  0x54   : > { %755 = vmatpush.bf16.msra.mxu0 %v1689_v6  ;;  %1804 = vmatpush.bf16.msra.mxu3 %v1689_v6  ;;  %v552_v6 = vpack.c.bf16 %v492_v4, %v491_v2  ;;  %v548_v2 = vadd.f32 %v2355_v3, %v480_v63  ;;  %p2061_p1 = pnand %p2060_p0, %p2056_p11 }
  0x55   : > { %924 = vmatpush.bf16.msra.mxu1 %v1693_v9 }
  0x56   : > { %1093 = vmatpush.bf16.msra.mxu2 %v2361_v10 }
  0x58   : > { %756 = vmatpush.bf16.msra.mxu0 %v1677_v23  ;;  %1805 = vmatpush.bf16.msra.mxu3 %v1677_v23  ;;  %v359_v23 = vld [vmem:[%s2292_s18 + $0x50] sm:$0xff] }
  0x59   : > { %925 = vmatpush.bf16.msra.mxu1 %v1681_v24  ;;  %v427_v30 = vmul.f32 %v2340_v52, %v359_v23  ;;  %v2510_v23 = vperm.slane %v613_v12, 2 }
  0x5a   : > { %1094 = vmatpush.bf16.msra.mxu2 %v2368_v27 }
  0x5b   : > { %757 = vmatmul.bf16.vlgmr.msra.gmra.mxu0 %v549_v28  ;;  %877 = vmatmul.bf16.vlgmr.msra.gmra.mxu3 %v2370_v29 }
  0x5c   : > { %1806 = vmatpush.bf16.msrb.mxu3 %v2309_v7  ;;  %926 = vmatmul.bf16.vlgmr.msra.gmra.mxu1 %v549_v28  ;;  %v468_v7 = vmul.f32 %v2340_v52, %v400_v33  ;;  %v495_v33 = vadd.f32 %v2355_v3, %v427_v30 }
  0x5d   : > { %1095 = vmatmul.bf16.vlgmr.msra.gmra.mxu2 %v549_v28  ;;  %v408_v28 = vld [vmem:[%s2292_s18 + $0x1d8] sm:$0xff] }
  0x5e   : > { %v536_v41 = vadd.f32 %v2355_v3, %v468_v7  ;;  %v476_v32 = vmul.f32 %v2340_v52, %v408_v28 }
  0x60   : > { %1807 = vmatpush.bf16.msrb.mxu3 %v2315_v16  ;;  %v535_v16 = vadd.f32 %v2355_v3, %v467_v38  ;;  %v544_v38 = vadd.f32 %v2355_v3, %v476_v32 }
  0x62   : > { %v2390_v43 = vpack.c.bf16 %v536_v41, %v535_v16  ;;  %v362_v16 = vld [vmem:[%s2292_s18 + $0x68] sm:$0xff]  ;;  %v409_v41 = vld [vmem:[%s2292_s18 + $0x1e0] sm:$0xff] }
  0x63   : > { %v477_v47 = vmul.f32 %v2340_v52, %v409_v41 }
  0x64   : > { %1808 = vmatpush.bf16.msrb.mxu3 %v2321_v25  ;;  %v353_v25 = vld [vmem:[%s2292_s18 + $0x20] sm:$0xff] }
  0x65   : > { %v421_v49 = vmul.f32 %v2340_v52, %v353_v25  ;;  %v429_v25 = vmul.f32 %v2340_v52, %v361_v40  ;;  %v545_v50 = vadd.f32 %v2355_v3, %v477_v47 }
  0x67   : > { %v489_v51 = vadd.f32 %v2355_v3, %v421_v49  ;;  %v497_v49 = vadd.f32 %v2355_v3, %v429_v25 }
  0x68   : > { %1809 = vmatpush.bf16.msrb.mxu3 %v2327_v34  ;;  %v422_v34 = vmul.f32 %v2340_v52, %v354_v44  ;;  %v430_v44 = vmul.f32 %v2340_v52, %v362_v16 }
  0x6a   : > { %v490_v53 = vadd.f32 %v2355_v3, %v422_v34  ;;  %v498_v34 = vadd.f32 %v2355_v3, %v430_v44 }
  0x6b   : > { %762 = vmatmul.bf16.gmra.mxu0 %v550_v42  ;;  %882 = vmatmul.bf16.gmra.mxu3 %v2390_v43 }
  0x6c   : > { %1810 = vmatpush.bf16.msrb.mxu3 %v2333_v45  ;;  %931 = vmatmul.bf16.gmra.mxu1 %v550_v42  ;;  %v470_v45 = vmul.f32 %v2340_v52, %v402_v48  ;;  %v551_v56 = vpack.c.bf16 %v490_v53, %v489_v51  ;;  %v555_v51 = vpack.c.bf16 %v498_v34, %v497_v49 }
  0x6d   : > { %1100 = vmatmul.bf16.gmra.mxu2 %v550_v42  ;;  %v410_v42 = vld [vmem:[%s2292_s18 + $0x1e8] sm:$0xff] }
  0x6e   : > { %v538_v55 = vadd.f32 %v2355_v3, %v470_v45  ;;  %v478_v48 = vmul.f32 %v2340_v52, %v410_v42 }
  0x70   : > { %1811 = vmatpush.bf16.msrb.mxu3 %v2347_v57  ;;  %v2407_v57 = vpack.c.bf16 %v538_v55, %v537_v54  ;;  %v546_v45 = vadd.f32 %v2355_v3, %v478_v48  ;;  %v363_v54 = vld [vmem:[%s2292_s18 + $0x70] sm:$0xff]  ;;  %v364_v55 = vld [vmem:[%s2292_s18 + $0x78] sm:$0xff] }
  0x71   : > { %v431_v60 = vmul.f32 %v2340_v52, %v363_v54  ;;  %v432_v61 = vmul.f32 %v2340_v52, %v364_v55  ;;  %v369_v54 = vld [vmem:[%s2292_s18 + $0xa0] sm:$0xff]  ;;  %v370_v55 = vld [vmem:[%s2292_s18 + $0xa8] sm:$0xff] }
  0x72   : > { %v2475_v53 = vpack.c.bf16 %v546_v45, %v545_v50 }
  0x73   : > { %v499_v0 = vadd.f32 %v2355_v3, %v431_v60  ;;  %v437_v60 = vmul.f32 %v2340_v52, %v369_v54 }
  0x74   : > { %1812 = vmatpush.bf16.msrb.mxu3 %v1693_v9 }
  0x78   : > { %1813 = vmatpush.bf16.msrb.mxu3 %v1681_v24  ;;  %v407_v24 = vld [vmem:[%s2292_s18 + $0x1d0] sm:$0xff] }
  0x7b   : > { %767 = vmatmul.bf16.gmra.mxu0 %v551_v56  ;;  %887 = vmatmul.bf16.gmra.mxu3 %v2407_v57 }
  0x7c   : > { %1814 = vmatpush.bf16.msra.mxu3 %v2311_v8  ;;  %936 = vmatmul.bf16.gmra.mxu1 %v551_v56  ;;  %v472_v8 = vmul.f32 %v2340_v52, %v404_v62 }
  0x7d   : > { %1105 = vmatmul.bf16.gmra.mxu2 %v551_v56  ;;  %v411_v56 = vld [vmem:[%s2292_s18 + $0x1f0] sm:$0xff] }
  0x7e   : > { %v540_v5 = vadd.f32 %v2355_v3, %v472_v8  ;;  %v479_v62 = vmul.f32 %v2340_v52, %v411_v56 }
  0x80   : > { %1815 = vmatpush.bf16.msra.mxu3 %v2317_v17  ;;  %v539_v17 = vadd.f32 %v2355_v3, %v471_v1  ;;  %v500_v1 = vadd.f32 %v2355_v3, %v432_v61  ;;  %v547_v8 = vadd.f32 %v2355_v3, %v479_v62  ;;  %v438_v61 = vmul.f32 %v2340_v52, %v370_v55  ;;  %v373_v55 = vld [vmem:[%s2292_s18 + $0xc0] sm:$0xff] }
  0x82   : > { %v2426_v9 = vpack.c.bf16 %v540_v5, %v539_v17  ;;  %v556_v4 = vpack.c.bf16 %v500_v1, %v499_v0  ;;  %v2490_v17 = vpack.c.bf16 %v548_v2, %v547_v8  ;;  %v365_v5 = vld [vmem:[%s2292_s18 + $0x80] sm:$0xff] }
  0x84   : > { %1816 = vmatpush.bf16.msra.mxu3 %v2323_v26  ;;  %v357_v26 = vld [vmem:[%s2292_s18 + $0x40] sm:$0xff] }
  0x85   : > { %v425_v14 = vmul.f32 %v2340_v52, %v357_v26  ;;  %v433_v26 = vmul.f32 %v2340_v52, %v365_v5  ;;  %v506_v5 = vadd.f32 %v2355_v3, %v438_v61 }
  0x87   : > { %v493_v18 = vadd.f32 %v2355_v3, %v425_v14 }
  0x88   : > { %1817 = vmatpush.bf16.msra.mxu3 %v2329_v35  ;;  %v426_v35 = vmul.f32 %v2340_v52, %v358_v11 }
  0x8a   : > { %v494_v19 = vadd.f32 %v2355_v3, %v426_v35  ;;  %v2502_v35 = vperm.slane %v613_v12, 0 }
  0x8b   : > { %772 = vmatmul.bf16.gmra.mxu0 %v552_v6  ;;  %892 = vmatmul.bf16.gmra.mxu3 %v2426_v9 }
  0x8c   : > { %1818 = vmatpush.bf16.msra.mxu3 %v2335_v46  ;;  %941 = vmatmul.bf16.gmra.mxu1 %v552_v6  ;;  %v474_v46 = vmul.f32 %v2340_v52, %v406_v13  ;;  %v553_v21 = vpack.c.bf16 %v494_v19, %v493_v18  ;;  %v501_v13 = vadd.f32 %v2355_v3, %v433_v26 }
  0x8d   : > { %1110 = vmatmul.bf16.gmra.mxu2 %v552_v6  ;;  %v366_v6 = vld [vmem:[%s2292_s18 + $0x88] sm:$0xff] }
  0x8e   : > { %v434_v11 = vmul.f32 %v2340_v52, %v366_v6 }
  0x90   : > { %1819 = vmatpush.bf16.msra.mxu3 %v2349_v58  ;;  %v542_v58 = vadd.f32 %v2355_v3, %v474_v46  ;;  %v502_v14 = vadd.f32 %v2355_v3, %v434_v11 }
  0x92   : > { %v2445_v22 = vpack.c.bf16 %v542_v58, %v541_v20  ;;  %v557_v46 = vpack.c.bf16 %v502_v14, %v501_v13 }
  0x94   : > { %1820 = vmatpush.bf16.msra.mxu3 %v2361_v10  ;;  %v360_v10 = vld [vmem:[%s2292_s18 + $0x58] sm:$0xff] }
  0x95   : > { %v428_v31 = vmul.f32 %v2340_v52, %v360_v10  ;;  %v367_v10 = vld [vmem:[%s2292_s18 + $0x90] sm:$0xff] }
  0x97   : > { %v496_v36 = vadd.f32 %v2355_v3, %v428_v31  ;;  %v435_v31 = vmul.f32 %v2340_v52, %v367_v10  ;;  %v372_v10 = vld [vmem:[%s2292_s18 + $0xb8] sm:$0xff] }
  0x98   : > { %1821 = vmatpush.bf16.msra.mxu3 %v2368_v27  ;;  %v475_v27 = vmul.f32 %v2340_v52, %v407_v24  ;;  %v368_v24 = vld [vmem:[%s2292_s18 + $0x98] sm:$0xff] }
  0x99   : > { %v554_v7 = vpack.c.bf16 %v496_v36, %v495_v33  ;;  %v503_v40 = vadd.f32 %v2355_v3, %v435_v31 }
  0x9a   : > { %v543_v37 = vadd.f32 %v2355_v3, %v475_v27  ;;  %v436_v27 = vmul.f32 %v2340_v52, %v368_v24 }
  0x9b   : > { %777 = vmatmul.bf16.gmra.mxu0 %v553_v21  ;;  %897 = vmatmul.bf16.gmra.mxu3 %v2445_v22 }
  0x9c   : > { %946 = vmatmul.bf16.gmra.mxu1 %v553_v21  ;;  %v2460_v39 = vpack.c.bf16 %v544_v38, %v543_v37  ;;  %v504_v16 = vadd.f32 %v2355_v3, %v436_v27  ;;  %v440_v27 = vmul.f32 %v2340_v52, %v372_v10 }
  0x9d   : > { %1115 = vmatmul.bf16.gmra.mxu2 %v553_v21 }
  0x9e   : > { %v558_v44 = vpack.c.bf16 %v504_v16, %v503_v40  ;;  %v508_v16 = vadd.f32 %v2355_v3, %v440_v27  ;;  %v376_v27 = vld [vmem:[%s2292_s18 + $0xd8] sm:$0xff] }
  0xab   : > { %782 = vmatmul.bf16.gmra.mxu0 %v554_v7  ;;  %902 = vmatmul.bf16.gmra.mxu3 %v2460_v39 }
  0xac   : > { %951 = vmatmul.bf16.gmra.mxu1 %v554_v7 }
  0xad   : > { %1120 = vmatmul.bf16.gmra.mxu2 %v554_v7 }
  0xbb   : > { %787 = vmatmul.bf16.gmra.mxu0 %v555_v51  ;;  %907 = vmatmul.bf16.gmra.mxu3 %v2475_v53 }
  0xbc   : > { %956 = vmatmul.bf16.gmra.mxu1 %v555_v51 }
  0xbd   : > { %1125 = vmatmul.bf16.gmra.mxu2 %v555_v51 }
  0xcb   : > { %792 = vmatmul.bf16.gmra.mxu0 %v556_v4  ;;  %912 = vmatmul.bf16.gmra.mxu3 %v2490_v17 }
  0xcc   : > { %961 = vmatmul.bf16.gmra.mxu1 %v556_v4 }
  0xcd   : > { %1130 = vmatmul.bf16.gmra.mxu2 %v556_v4  ;;  %v505_v4 = vadd.f32 %v2355_v3, %v437_v60 }
  0xcf   : > { %v559_v12 = vpack.c.bf16 %v506_v5, %v505_v4 }
  0xd8   : > { %v758_v18 = vpop.f32.mrf.mxu0 }
  0xd9   : > { %v759_v19 = vadd.f32 %v758_v18, %v2502_v35  ;;  %v927_v20 = vpop.f32.mrf.mxu1 }
  0xda   : > { %v928_v58 = vadd.f32 %v927_v20, %v2504_v15 }
  0xdb   : > { %797 = vmatmul.bf16.gmra.mxu0 %v557_v46  ;;  %1046 = vmatmul.bf16.vlgmr.msrb.gmra.mxu3 %v2370_v29 }
  0xdc   : > { %v1256_v21 = vpack.c.bf16 %v928_v58, %v759_v19  ;;  %966 = vmatmul.bf16.gmra.mxu1 %v557_v46 }
  0xdd   : > { %1135 = vmatmul.bf16.gmra.mxu2 %v557_v46 }
  0xde   : > { %1384 = vst [vmem:[%s2514_s16] sm:$0xff] %v1256_v21  ;;  %v2517_v28 = vpop.f32.mrf.mxu3  ;;  %v371_v21 = vld [vmem:[%s2292_s18 + $0xb0] sm:$0xff] }
  0xdf   : > { %v439_v31 = vmul.f32 %v2340_v52, %v371_v21 }
  0xe0   : > { %v1096_v30 = vpop.f32.mrf.mxu2  ;;  %v760_v33 = vpop.f32.mrf.mxu0 }
  0xe1   : > { %v1097_v32 = vadd.f32 %v1096_v30, %v2510_v23  ;;  %v761_v36 = vadd.f32 %v760_v33, %v2502_v35  ;;  %v929_v37 = vpop.f32.mrf.mxu1  ;;  %v507_v40 = vadd.f32 %v2355_v3, %v439_v31  ;;  %v375_v31 = vld [vmem:[%s2292_s18 + $0xd0] sm:$0xff] }
  0xe2   : > { %v930_v7 = vadd.f32 %v929_v37, %v2504_v15 }
  0xe3   : > { %v1257_v38 = vpack.c.bf16 %v1097_v32, %v1097_v32 }
  0xe4   : > { %v1258_v41 = vpack.c.bf16 %v930_v7, %v761_v36 }
  0xe5   : > { %1385 = vst [vmem:[%s2514_s16 + $0x8] sm:$0xf] %v1257_v38 }
  0xe6   : > { %1386 = vst [vmem:[%s2514_s16 + $0xc] sm:$0xff] %v1258_v41  ;;  %v2528_v42 = vpop.f32.mrf.mxu3 }
  0xe8   : > { %v1098_v25 = vpop.f32.mrf.mxu2  ;;  %v763_v48 = vpop.f32.mrf.mxu0 }
  0xe9   : > { %v1099_v47 = vadd.f32 %v1098_v25, %v2510_v23  ;;  %v764_v49 = vadd.f32 %v763_v48, %v2502_v35  ;;  %v932_v34 = vpop.f32.mrf.mxu1 }
  0xea   : > { %v933_v45 = vadd.f32 %v932_v34, %v2504_v15 }
  0xeb   : > { %v1259_v50 = vpack.c.bf16 %v1099_v47, %v1099_v47  ;;  %802 = vmatmul.bf16.gmra.mxu0 %v558_v44  ;;  %1051 = vmatmul.bf16.gmra.mxu3 %v2390_v43  ;;  %v560_v47 = vpack.c.bf16 %v508_v16, %v507_v40 }
  0xec   : > { %v1260_v51 = vpack.c.bf16 %v933_v45, %v764_v49  ;;  %971 = vmatmul.bf16.gmra.mxu1 %v558_v44 }
  0xed   : > { %1387 = vst [vmem:[%s2514_s16 + $0x14] sm:$0xf] %v1259_v50  ;;  %1140 = vmatmul.bf16.gmra.mxu2 %v558_v44 }
  0xee   : > { %1388 = vst [vmem:[%s2514_s16 + $0x18] sm:$0xff] %v1260_v51  ;;  %v2538_v56 = vpop.f32.mrf.mxu3 }
  0xf0   : > { %v1101_v59 = vpop.f32.mrf.mxu2  ;;  %v765_v63 = vpop.f32.mrf.mxu0 }
  0xf1   : > { %v1102_v62 = vadd.f32 %v1101_v59, %v2510_v23  ;;  %v766_v0 = vadd.f32 %v765_v63, %v2502_v35  ;;  %v934_v1 = vpop.f32.mrf.mxu1  ;;  %v374_v59 = vld [vmem:[%s2292_s18 + $0xc8] sm:$0xff] }
  0xf2   : > { %v935_v2 = vadd.f32 %v934_v1, %v2504_v15  ;;  %v442_v63 = vmul.f32 %v2340_v52, %v374_v59 }
  0xf3   : > { %v1261_v8 = vpack.c.bf16 %v1102_v62, %v1102_v62  ;;  %v441_v62 = vmul.f32 %v2340_v52, %v373_v55 }
  0xf4   : > { %v1262_v6 = vpack.c.bf16 %v935_v2, %v766_v0 }
  0xf5   : > { %1389 = vst [vmem:[%s2514_s16 + $0x20] sm:$0xf] %v1261_v8 }
  0xf6   : > { %1390 = vst [vmem:[%s2514_s16 + $0x24] sm:$0xff] %v1262_v6  ;;  %v2549_v26 = vpop.f32.mrf.mxu3  ;;  %v509_v6 = vadd.f32 %v2355_v3, %v441_v62 }
  0xf8   : > { %v1103_v11 = vpop.f32.mrf.mxu2  ;;  %v768_v14 = vpop.f32.mrf.mxu0 }
  0xf9   : > { %v1104_v13 = vadd.f32 %v1103_v11, %v2510_v23  ;;  %v769_v46 = vadd.f32 %v768_v14, %v2502_v35  ;;  %v937_v18 = vpop.f32.mrf.mxu1  ;;  %v510_v11 = vadd.f32 %v2355_v3, %v442_v63 }
  0xfa   : > { %v938_v20 = vadd.f32 %v937_v18, %v2504_v15 }
  0xfb   : > { %v1263_v19 = vpack.c.bf16 %v1104_v13, %v1104_v13  ;;  %807 = vmatmul.bf16.gmra.mxu0 %v559_v12  ;;  %1056 = vmatmul.bf16.gmra.mxu3 %v2407_v57 }
  0xfc   : > { %v1264_v58 = vpack.c.bf16 %v938_v20, %v769_v46  ;;  %976 = vmatmul.bf16.gmra.mxu1 %v559_v12  ;;  %v561_v46 = vpack.c.bf16 %v510_v11, %v509_v6 }
  0xfd   : > { %1391 = vst [vmem:[%s2514_s16 + $0x2c] sm:$0xf] %v1263_v19  ;;  %1145 = vmatmul.bf16.gmra.mxu2 %v559_v12 }
  0xfe   : > { %1392 = vst [vmem:[%s2514_s16 + $0x30] sm:$0xff] %v1264_v58  ;;  %v2559_v24 = vpop.f32.mrf.mxu3 }
 0x100   : > { %v1106_v30 = vpop.f32.mrf.mxu2  ;;  %v770_v33 = vpop.f32.mrf.mxu0 }
 0x101   : > { %v1107_v32 = vadd.f32 %v1106_v30, %v2510_v23  ;;  %v771_v36 = vadd.f32 %v770_v33, %v2502_v35  ;;  %v939_v37 = vpop.f32.mrf.mxu1 }
 0x102   : > { %v940_v7 = vadd.f32 %v939_v37, %v2504_v15  ;;  %v444_v37 = vmul.f32 %v2340_v52, %v376_v27 }
 0x103   : > { %v1265_v38 = vpack.c.bf16 %v1107_v32, %v1107_v32 }
 0x104   : > { %v1266_v41 = vpack.c.bf16 %v940_v7, %v771_v36  ;;  %v443_v36 = vmul.f32 %v2340_v52, %v375_v31 }
 0x105   : > { %1393 = vst [vmem:[%s2514_s16 + $0x38] sm:$0xf] %v1265_v38 }
 0x106   : > { %1394 = vst [vmem:[%s2514_s16 + $0x3c] sm:$0xff] %v1266_v41  ;;  %v2570_v25 = vpop.f32.mrf.mxu3 }
 0x108   : > { %v1108_v44 = vpop.f32.mrf.mxu2  ;;  %v773_v49 = vpop.f32.mrf.mxu0 }
 0x109   : > { %v1109_v48 = vadd.f32 %v1108_v44, %v2510_v23  ;;  %v774_v34 = vadd.f32 %v773_v49, %v2502_v35  ;;  %v942_v50 = vpop.f32.mrf.mxu1 }
 0x10a   : > { %v943_v51 = vadd.f32 %v942_v50, %v2504_v15 }
 0x10b   : > { %v1267_v45 = vpack.c.bf16 %v1109_v48, %v1109_v48  ;;  %812 = vmatmul.bf16.gmra.mxu0 %v560_v47  ;;  %1061 = vmatmul.bf16.gmra.mxu3 %v2426_v9  ;;  %v512_v48 = vadd.f32 %v2355_v3, %v444_v37 }
 0x10c   : > { %v1268_v54 = vpack.c.bf16 %v943_v51, %v774_v34  ;;  %981 = vmatmul.bf16.gmra.mxu1 %v560_v47 }
 0x10d   : > { %1395 = vst [vmem:[%s2514_s16 + $0x44] sm:$0xf] %v1267_v45  ;;  %1150 = vmatmul.bf16.gmra.mxu2 %v560_v47  ;;  %v511_v47 = vadd.f32 %v2355_v3, %v443_v36 }
 0x10e   : > { %1396 = vst [vmem:[%s2514_s16 + $0x48] sm:$0xff] %v1268_v54  ;;  %v2580_v60 = vpop.f32.mrf.mxu3 }
 0x10f   : > { %v562_v45 = vpack.c.bf16 %v512_v48, %v511_v47 }
 0x110   : > { %v1111_v61 = vpop.f32.mrf.mxu2  ;;  %v775_v1 = vpop.f32.mrf.mxu0 }
 0x111   : > { %v1112_v0 = vadd.f32 %v1111_v61, %v2510_v23  ;;  %v776_v8 = vadd.f32 %v775_v1, %v2502_v35  ;;  %v944_v2 = vpop.f32.mrf.mxu1  ;;  %v378_v1 = vld [vmem:[%s2292_s18 + $0xe8] sm:$0xff] }
 0x112   : > { %v945_v5 = vadd.f32 %v944_v2, %v2504_v15 }
 0x113   : > { %v1269_v4 = vpack.c.bf16 %v1112_v0, %v1112_v0  ;;  %v377_v0 = vld [vmem:[%s2292_s18 + $0xe0] sm:$0xff] }
 0x114   : > { %v1270_v12 = vpack.c.bf16 %v945_v5, %v776_v8  ;;  %v446_v5 = vmul.f32 %v2340_v52, %v378_v1 }
 0x115   : > { %1397 = vst [vmem:[%s2514_s16 + $0x50] sm:$0xf] %v1269_v4  ;;  %v445_v4 = vmul.f32 %v2340_v52, %v377_v0 }
 0x116   : > { %1398 = vst [vmem:[%s2514_s16 + $0x54] sm:$0xff] %v1270_v12  ;;  %v2591_v13 = vpop.f32.mrf.mxu3 }
 0x118   : > { %v1113_v14 = vpop.f32.mrf.mxu2  ;;  %v778_v19 = vpop.f32.mrf.mxu0 }
 0x119   : > { %v1114_v18 = vadd.f32 %v1113_v14, %v2510_v23  ;;  %v779_v20 = vadd.f32 %v778_v19, %v2502_v35  ;;  %v947_v58 = vpop.f32.mrf.mxu1  ;;  %v513_v19 = vadd.f32 %v2355_v3, %v445_v4 }
 0x11a   : > { %v948_v10 = vadd.f32 %v947_v58, %v2504_v15 }
 0x11b   : > { %v1271_v21 = vpack.c.bf16 %v1114_v18, %v1114_v18  ;;  %817 = vmatmul.bf16.gmra.mxu0 %v561_v46  ;;  %1066 = vmatmul.bf16.gmra.mxu3 %v2445_v22 }
 0x11c   : > { %v1272_v30 = vpack.c.bf16 %v948_v10, %v779_v20  ;;  %986 = vmatmul.bf16.gmra.mxu1 %v561_v46  ;;  %v514_v20 = vadd.f32 %v2355_v3, %v446_v5 }
 0x11d   : > { %1399 = vst [vmem:[%s2514_s16 + $0x5c] sm:$0xf] %v1271_v21  ;;  %1155 = vmatmul.bf16.gmra.mxu2 %v561_v46 }
 0x11e   : > { %1400 = vst [vmem:[%s2514_s16 + $0x60] sm:$0xff] %v1272_v30  ;;  %v2601_v32 = vpop.f32.mrf.mxu3  ;;  %v563_v30 = vpack.c.bf16 %v514_v20, %v513_v19 }
 0x120   : > { %v1116_v33 = vpop.f32.mrf.mxu2  ;;  %v780_v7 = vpop.f32.mrf.mxu0 }
 0x121   : > { %v1117_v38 = vadd.f32 %v1116_v33, %v2510_v23  ;;  %v781_v40 = vadd.f32 %v780_v7, %v2502_v35  ;;  %v949_v16 = vpop.f32.mrf.mxu1 }
 0x122   : > { %v950_v44 = vadd.f32 %v949_v16, %v2504_v15  ;;  %v380_v16 = vld [vmem:[%s2292_s18 + $0xf8] sm:$0xff] }
 0x123   : > { %v1273_v41 = vpack.c.bf16 %v1117_v38, %v1117_v38  ;;  %v448_v48 = vmul.f32 %v2340_v52, %v380_v16 }
 0x124   : > { %v1274_v49 = vpack.c.bf16 %v950_v44, %v781_v40  ;;  %v379_v40 = vld [vmem:[%s2292_s18 + $0xf0] sm:$0xff] }
 0x125   : > { %1401 = vst [vmem:[%s2514_s16 + $0x68] sm:$0xf] %v1273_v41  ;;  %v447_v47 = vmul.f32 %v2340_v52, %v379_v40 }
 0x126   : > { %1402 = vst [vmem:[%s2514_s16 + $0x6c] sm:$0xff] %v1274_v49  ;;  %v2612_v34 = vpop.f32.mrf.mxu3 }
 0x128   : > { %v1118_v50 = vpop.f32.mrf.mxu2  ;;  %v783_v54 = vpop.f32.mrf.mxu0 }
 0x129   : > { %v1119_v51 = vadd.f32 %v1118_v50, %v2510_v23  ;;  %v784_v55 = vadd.f32 %v783_v54, %v2502_v35  ;;  %v952_v59 = vpop.f32.mrf.mxu1 }
 0x12a   : > { %v953_v62 = vadd.f32 %v952_v59, %v2504_v15  ;;  %v515_v59 = vadd.f32 %v2355_v3, %v447_v47 }
 0x12b   : > { %v1275_v61 = vpack.c.bf16 %v1119_v51, %v1119_v51  ;;  %822 = vmatmul.bf16.gmra.mxu0 %v562_v45  ;;  %1071 = vmatmul.bf16.gmra.mxu3 %v2460_v39 }
 0x12c   : > { %v1276_v63 = vpack.c.bf16 %v953_v62, %v784_v55  ;;  %991 = vmatmul.bf16.gmra.mxu1 %v562_v45 }
 0x12d   : > { %1403 = vst [vmem:[%s2514_s16 + $0x74] sm:$0xf] %v1275_v61  ;;  %1160 = vmatmul.bf16.gmra.mxu2 %v562_v45  ;;  %v516_v61 = vadd.f32 %v2355_v3, %v448_v48 }
 0x12e   : > { %1404 = vst [vmem:[%s2514_s16 + $0x78] sm:$0xff] %v1276_v63  ;;  %v2622_v8 = vpop.f32.mrf.mxu3 }
 0x12f   : > { %v564_v1 = vpack.c.bf16 %v516_v61, %v515_v59  ;;  %v383_v59 = vld [vmem:[%s2292_s18 + $0x110] sm:$0xff]  ;;  %v384_v61 = vld [vmem:[%s2292_s18 + $0x118] sm:$0xff] }
 0x130   : > { %v1121_v2 = vpop.f32.mrf.mxu2  ;;  %v785_v11 = vpop.f32.mrf.mxu0 }
 0x131   : > { %v1122_v6 = vadd.f32 %v1121_v2, %v2510_v23  ;;  %v786_v12 = vadd.f32 %v785_v11, %v2502_v35  ;;  %v954_v14 = vpop.f32.mrf.mxu1 }
 0x132   : > { %v955_v18 = vadd.f32 %v954_v14, %v2504_v15 }
 0x133   : > { %v1277_v46 = vpack.c.bf16 %v1122_v6, %v1122_v6 }
 0x134   : > { %v1278_v58 = vpack.c.bf16 %v955_v18, %v786_v12  ;;  %v382_v18 = vld [vmem:[%s2292_s18 + $0x108] sm:$0xff] }
 0x135   : > { %1405 = vst [vmem:[%s2514_s16 + $0x80] sm:$0xf] %v1277_v46  ;;  %v381_v46 = vld [vmem:[%s2292_s18 + $0x100] sm:$0xff] }
 0x136   : > { %1406 = vst [vmem:[%s2514_s16 + $0x84] sm:$0xff] %v1278_v58  ;;  %v2633_v21 = vpop.f32.mrf.mxu3  ;;  %v449_v58 = vmul.f32 %v2340_v52, %v381_v46 }
 0x138   : > { %v1123_v10 = vpop.f32.mrf.mxu2  ;;  %v788_v27 = vpop.f32.mrf.mxu0 }
 0x139   : > { %v1124_v31 = vadd.f32 %v1123_v10, %v2510_v23  ;;  %v789_v33 = vadd.f32 %v788_v27, %v2502_v35  ;;  %v957_v36 = vpop.f32.mrf.mxu1  ;;  %v450_v10 = vmul.f32 %v2340_v52, %v382_v18 }
 0x13a   : > { %v958_v38 = vadd.f32 %v957_v36, %v2504_v15 }
 0x13b   : > { %v1279_v37 = vpack.c.bf16 %v1124_v31, %v1124_v31  ;;  %827 = vmatmul.bf16.gmra.mxu0 %v563_v30  ;;  %1076 = vmatmul.bf16.gmra.mxu3 %v2475_v53 }
 0x13c   : > { %v1280_v7 = vpack.c.bf16 %v958_v38, %v789_v33  ;;  %996 = vmatmul.bf16.gmra.mxu1 %v563_v30  ;;  %v517_v38 = vadd.f32 %v2355_v3, %v449_v58 }
 0x13d   : > { %1407 = vst [vmem:[%s2514_s16 + $0x8c] sm:$0xf] %v1279_v37  ;;  %1165 = vmatmul.bf16.gmra.mxu2 %v563_v30 }
 0x13e   : > { %1408 = vst [vmem:[%s2514_s16 + $0x90] sm:$0xff] %v1280_v7  ;;  %v2643_v41 = vpop.f32.mrf.mxu3  ;;  %v518_v7 = vadd.f32 %v2355_v3, %v450_v10  ;;  %v881_v10 = vadd.f32 %v2528_v42, %v2502_v35 }
 0x140   : > { %v1126_v44 = vpop.f32.mrf.mxu2  ;;  %v790_v50 = vpop.f32.mrf.mxu0  ;;  %v565_v47 = vpack.c.bf16 %v518_v7, %v517_v38 }
 0x141   : > { %v1127_v49 = vadd.f32 %v1126_v44, %v2510_v23  ;;  %v791_v45 = vadd.f32 %v790_v50, %v2502_v35  ;;  %v959_v51 = vpop.f32.mrf.mxu1 }
 0x142   : > { %v960_v55 = vadd.f32 %v959_v51, %v2504_v15 }
 0x143   : > { %v1281_v54 = vpack.c.bf16 %v1127_v49, %v1127_v49 }
 0x144   : > { %v1282_v62 = vpack.c.bf16 %v960_v55, %v791_v45 }
 0x145   : > { %1409 = vst [vmem:[%s2514_s16 + $0x98] sm:$0xf] %v1281_v54 }
 0x146   : > { %1410 = vst [vmem:[%s2514_s16 + $0x9c] sm:$0xff] %v1282_v62  ;;  %v2654_v63 = vpop.f32.mrf.mxu3 }
 0x148   : > { %v1128_v0 = vpop.f32.mrf.mxu2  ;;  %v793_v4 = vpop.f32.mrf.mxu0 }
 0x149   : > { %v1129_v2 = vadd.f32 %v1128_v0, %v2510_v23  ;;  %v794_v5 = vadd.f32 %v793_v4, %v2502_v35  ;;  %v962_v6 = vpop.f32.mrf.mxu1  ;;  %v879_v0 = vadd.f32 %v2517_v28, %v2502_v35  ;;  %v451_v4 = vmul.f32 %v2340_v52, %v383_v59 }
 0x14a   : > { %v963_v12 = vadd.f32 %v962_v6, %v2504_v15 }
 0x14b   : > { %v1283_v11 = vpack.c.bf16 %v1129_v2, %v1129_v2  ;;  %832 = vmatmul.bf16.gmra.mxu0 %v564_v1  ;;  %1081 = vmatmul.bf16.gmra.mxu3 %v2490_v17  ;;  %v519_v28 = vadd.f32 %v2355_v3, %v451_v4 }
 0x14c   : > { %v1284_v14 = vpack.c.bf16 %v963_v12, %v794_v5  ;;  %1001 = vmatmul.bf16.gmra.mxu1 %v564_v1 }
 0x14d   : > { %1411 = vst [vmem:[%s2514_s16 + $0xa4] sm:$0xf] %v1283_v11  ;;  %1170 = vmatmul.bf16.gmra.mxu2 %v564_v1 }
 0x14e   : > { %1412 = vst [vmem:[%s2514_s16 + $0xa8] sm:$0xff] %v1284_v14  ;;  %v2664_v19 = vpop.f32.mrf.mxu3 }
 0x150   : > { %v1131_v20 = vpop.f32.mrf.mxu2  ;;  %v795_v31 = vpop.f32.mrf.mxu0 }
 0x151   : > { %v1132_v30 = vadd.f32 %v1131_v20, %v2510_v23  ;;  %v796_v27 = vadd.f32 %v795_v31, %v2502_v35  ;;  %v964_v33 = vpop.f32.mrf.mxu1 }
 0x152   : > { %v965_v37 = vadd.f32 %v964_v33, %v2504_v15 }
 0x153   : > { %v1285_v36 = vpack.c.bf16 %v1132_v30, %v1132_v30 }
 0x154   : > { %v1286_v40 = vpack.c.bf16 %v965_v37, %v796_v27 }
 0x155   : > { %1413 = vst [vmem:[%s2514_s16 + $0xb0] sm:$0xf] %v1285_v36 }
 0x156   : > { %1414 = vst [vmem:[%s2514_s16 + $0xb4] sm:$0xff] %v1286_v40  ;;  %v2675_v16 = vpop.f32.mrf.mxu3 }
 0x158   : > { %v1133_v44 = vpop.f32.mrf.mxu2  ;;  %v798_v49 = vpop.f32.mrf.mxu0 }
 0x159   : > { %v1134_v48 = vadd.f32 %v1133_v44, %v2510_v23  ;;  %v799_v50 = vadd.f32 %v798_v49, %v2502_v35  ;;  %v967_v45 = vpop.f32.mrf.mxu1  ;;  %v385_v44 = vld [vmem:[%s2292_s18 + $0x120] sm:$0xff]  ;;  %v884_v49 = vadd.f32 %v2538_v56, %v2502_v35 }
 0x15a   : > { %v968_v54 = vadd.f32 %v967_v45, %v2504_v15 }
 0x15b   : > { %v1287_v51 = vpack.c.bf16 %v1134_v48, %v1134_v48  ;;  %837 = vmatmul.bf16.gmra.mxu0 %v565_v47  ;;  %1215 = vmatmul.bf16.vlgmr.msra.gmra.mxu3 %v2370_v29  ;;  %v452_v29 = vmul.f32 %v2340_v52, %v384_v61 }
 0x15c   : > { %v1288_v55 = vpack.c.bf16 %v968_v54, %v799_v50  ;;  %1006 = vmatmul.bf16.gmra.mxu1 %v565_v47 }
 0x15d   : > { %1415 = vst [vmem:[%s2514_s16 + $0xbc] sm:$0xf] %v1287_v51  ;;  %1175 = vmatmul.bf16.gmra.mxu2 %v565_v47  ;;  %v520_v20 = vadd.f32 %v2355_v3, %v452_v29  ;;  %v386_v47 = vld [vmem:[%s2292_s18 + $0x128] sm:$0xff]  ;;  %v2715_v51 = vld [vmem:[%s297_s30] ss:$0 sm:$0xff] }
 0x15e   : > { %1416 = vst [vmem:[%s2514_s16 + $0xc0] sm:$0xff] %v1288_v55  ;;  %v1047_v62 = vpop.f32.mrf.mxu3  ;;  %v454_v54 = vmul.f32 %v2715_v51, %v386_v47 }
 0x15f   : > { %v1048_v1 = vadd.f32 %v1047_v62, %v2504_v15  ;;  %v566_v27 = vpack.c.bf16 %v520_v20, %v519_v28 }
 0x160   : > { %v1136_v2 = vpop.f32.mrf.mxu2  ;;  %v800_v6 = vpop.f32.mrf.mxu0 }
 0x161   : > { %v1137_v5 = vadd.f32 %v1136_v2, %v2510_v23  ;;  %v1352_v11 = vpack.c.bf16 %v1048_v1, %v879_v0  ;;  %v801_v12 = vadd.f32 %v800_v6, %v2502_v35  ;;  %v969_v14 = vpop.f32.mrf.mxu1  ;;  %v2725_v2 = vld [vmem:[%s306_s6] ss:$0 sm:$0xff] }
 0x162   : > { %v970_v18 = vadd.f32 %v969_v14, %v2504_v15  ;;  %v522_v29 = vadd.f32 %v2725_v2, %v454_v54  ;;  %v891_v54 = vadd.f32 %v2570_v25, %v2502_v35 }
 0x163   : > { %v1289_v46 = vpack.c.bf16 %v1137_v5, %v1137_v5  ;;  %1480 = vst [vmem:[%s2514_s16 + $0x240] sm:$0xff] %v1352_v11  ;;  %v886_v11 = vadd.f32 %v2549_v26, %v2502_v35 }
 0x164   : > { %v1290_v58 = vpack.c.bf16 %v970_v18, %v801_v12 }
 0x165   : > { %1417 = vst [vmem:[%s2514_s16 + $0xc8] sm:$0xf] %v1289_v46 }
 0x166   : > { %1418 = vst [vmem:[%s2514_s16 + $0xcc] sm:$0xff] %v1290_v58  ;;  %v1049_v52 = vpop.f32.mrf.mxu3 }
 0x167   : > { %v1050_v30 = vadd.f32 %v1049_v52, %v2504_v15 }
 0x168   : > { %v1138_v31 = vpop.f32.mrf.mxu2  ;;  %v803_v36 = vpop.f32.mrf.mxu0 }
 0x169   : > { %v1139_v33 = vadd.f32 %v1138_v31, %v2510_v23  ;;  %v1354_v3 = vpack.c.bf16 %v1050_v30, %v881_v10  ;;  %v804_v37 = vadd.f32 %v803_v36, %v2502_v35  ;;  %v972_v38 = vpop.f32.mrf.mxu1  ;;  %v387_v31 = vld [vmem:[%s2292_s18 + $0x130] sm:$0xff]  ;;  %v889_v36 = vadd.f32 %v2559_v24, %v2502_v35 }
 0x16a   : > { %v973_v40 = vadd.f32 %v972_v38, %v2504_v15  ;;  %v455_v38 = vmul.f32 %v2715_v51, %v387_v31 }
 0x16b   : > { %v1291_v7 = vpack.c.bf16 %v1139_v33, %v1139_v33  ;;  %1482 = vst [vmem:[%s2514_s16 + $0x24c] sm:$0xff] %v1354_v3  ;;  %842 = vmatmul.bf16.gmra.mxu0 %v566_v27  ;;  %1220 = vmatmul.bf16.gmra.mxu3 %v2390_v43  ;;  %v453_v43 = vmul.f32 %v2715_v51, %v385_v44 }
 0x16c   : > { %v1292_v42 = vpack.c.bf16 %v973_v40, %v804_v37  ;;  %1011 = vmatmul.bf16.gmra.mxu1 %v566_v27  ;;  %v523_v24 = vadd.f32 %v2725_v2, %v455_v38 }
 0x16d   : > { %1419 = vst [vmem:[%s2514_s16 + $0xd4] sm:$0xf] %v1291_v7  ;;  %1180 = vmatmul.bf16.gmra.mxu2 %v566_v27  ;;  %v521_v4 = vadd.f32 %v2725_v2, %v453_v43  ;;  %v388_v27 = vld [vmem:[%s2292_s18 + $0x138] sm:$0xff] }
 0x16e   : > { %1420 = vst [vmem:[%s2514_s16 + $0xd8] sm:$0xff] %v1292_v42  ;;  %v1052_v48 = vpop.f32.mrf.mxu3 }
 0x16f   : > { %v1053_v50 = vadd.f32 %v1052_v48, %v2504_v15  ;;  %v567_v46 = vpack.c.bf16 %v522_v29, %v521_v4 }
 0x170   : > { %v1141_v45 = vpop.f32.mrf.mxu2  ;;  %v805_v59 = vpop.f32.mrf.mxu0 }
 0x171   : > { %v1142_v55 = vadd.f32 %v1141_v45, %v2510_v23  ;;  %v1356_v61 = vpack.c.bf16 %v1053_v50, %v884_v49  ;;  %v806_v62 = vadd.f32 %v805_v59, %v2502_v35  ;;  %v974_v0 = vpop.f32.mrf.mxu1 }
 0x172   : > { %v975_v1 = vadd.f32 %v974_v0, %v2504_v15 }
 0x173   : > { %v1293_v56 = vpack.c.bf16 %v1142_v55, %v1142_v55  ;;  %1484 = vst [vmem:[%s2514_s16 + $0x258] sm:$0xff] %v1356_v61 }
 0x174   : > { %v1294_v5 = vpack.c.bf16 %v975_v1, %v806_v62 }
 0x175   : > { %1421 = vst [vmem:[%s2514_s16 + $0xe0] sm:$0xf] %v1293_v56 }
 0x176   : > { %1422 = vst [vmem:[%s2514_s16 + $0xe4] sm:$0xff] %v1294_v5  ;;  %v1054_v6 = vpop.f32.mrf.mxu3 }
 0x177   : > { %v1055_v12 = vadd.f32 %v1054_v6, %v2504_v15  ;;  %v389_v6 = vld [vmem:[%s2292_s18 + $0x140] sm:$0xff] }
 0x178   : > { %v1143_v14 = vpop.f32.mrf.mxu2  ;;  %v808_v28 = vpop.f32.mrf.mxu0 }
 0x179   : > { %v1144_v18 = vadd.f32 %v1143_v14, %v2510_v23  ;;  %v1358_v20 = vpack.c.bf16 %v1055_v12, %v886_v11  ;;  %v809_v58 = vadd.f32 %v808_v28, %v2502_v35  ;;  %v977_v52 = vpop.f32.mrf.mxu1  ;;  %v390_v11 = vld [vmem:[%s2292_s18 + $0x148] sm:$0xff]  ;;  %v894_v14 = vadd.f32 %v2580_v60, %v2502_v35 }
 0x17a   : > { %v978_v30 = vadd.f32 %v977_v52, %v2504_v15  ;;  %v457_v28 = vmul.f32 %v2715_v51, %v389_v6 }
 0x17b   : > { %v1295_v10 = vpack.c.bf16 %v1144_v18, %v1144_v18  ;;  %1486 = vst [vmem:[%s2514_s16 + $0x264] sm:$0xff] %v1358_v20  ;;  %847 = vmatmul.bf16.gmra.mxu0 %v567_v46  ;;  %1225 = vmatmul.bf16.gmra.mxu3 %v2407_v57  ;;  %v456_v57 = vmul.f32 %v2715_v51, %v388_v27 }
 0x17c   : > { %v1296_v26 = vpack.c.bf16 %v978_v30, %v809_v58  ;;  %1016 = vmatmul.bf16.gmra.mxu1 %v567_v46  ;;  %v525_v60 = vadd.f32 %v2725_v2, %v457_v28 }
 0x17d   : > { %1423 = vst [vmem:[%s2514_s16 + $0xec] sm:$0xf] %v1295_v10  ;;  %1185 = vmatmul.bf16.gmra.mxu2 %v567_v46  ;;  %v524_v50 = vadd.f32 %v2725_v2, %v456_v57 }
 0x17e   : > { %1424 = vst [vmem:[%s2514_s16 + $0xf0] sm:$0xff] %v1296_v26  ;;  %v1057_v33 = vpop.f32.mrf.mxu3 }
 0x17f   : > { %v1058_v3 = vadd.f32 %v1057_v33, %v2504_v15  ;;  %v568_v61 = vpack.c.bf16 %v524_v50, %v523_v24  ;;  %v391_v24 = vld [vmem:[%s2292_s18 + $0x150] sm:$0xff]  ;;  %v392_v50 = vld [vmem:[%s2292_s18 + $0x158] sm:$0xff] }
 0x180   : > { %v1146_v37 = vpop.f32.mrf.mxu2  ;;  %v810_v40 = vpop.f32.mrf.mxu0 }
 0x181   : > { %v1147_v7 = vadd.f32 %v1146_v37, %v2510_v23  ;;  %v1360_v42 = vpack.c.bf16 %v1058_v3, %v889_v36  ;;  %v811_v44 = vadd.f32 %v810_v40, %v2502_v35  ;;  %v979_v47 = vpop.f32.mrf.mxu1  ;;  %v896_v3 = vadd.f32 %v2591_v13, %v2502_v35 }
 0x182   : > { %v980_v49 = vadd.f32 %v979_v47, %v2504_v15 }
 0x183   : > { %v1297_v48 = vpack.c.bf16 %v1147_v7, %v1147_v7  ;;  %1488 = vst [vmem:[%s2514_s16 + $0x270] sm:$0xff] %v1360_v42 }
 0x184   : > { %v1298_v45 = vpack.c.bf16 %v980_v49, %v811_v44 }
 0x185   : > { %1425 = vst [vmem:[%s2514_s16 + $0xf8] sm:$0xf] %v1297_v48 }
 0x186   : > { %1426 = vst [vmem:[%s2514_s16 + $0xfc] sm:$0xff] %v1298_v45  ;;  %v1059_v43 = vpop.f32.mrf.mxu3 }
 0x187   : > { %v1060_v55 = vadd.f32 %v1059_v43, %v2504_v15  ;;  %v899_v43 = vadd.f32 %v2601_v32, %v2502_v35 }
 0x188   : > { %v1148_v59 = vpop.f32.mrf.mxu2  ;;  %v813_v0 = vpop.f32.mrf.mxu0 }
 0x189   : > { %v1149_v62 = vadd.f32 %v1148_v59, %v2510_v23  ;;  %v1362_v56 = vpack.c.bf16 %v1060_v55, %v891_v54  ;;  %v814_v1 = vadd.f32 %v813_v0, %v2502_v35  ;;  %v982_v4 = vpop.f32.mrf.mxu1  ;;  %v459_v59 = vmul.f32 %v2715_v51, %v391_v24 }
 0x18a   : > { %v983_v5 = vadd.f32 %v982_v4, %v2504_v15 }
 0x18b   : > { %v1299_v29 = vpack.c.bf16 %v1149_v62, %v1149_v62  ;;  %1490 = vst [vmem:[%s2514_s16 + $0x27c] sm:$0xff] %v1362_v56  ;;  %852 = vmatmul.bf16.gmra.mxu0 %v568_v61  ;;  %1230 = vmatmul.bf16.gmra.mxu3 %v2426_v9  ;;  %v458_v9 = vmul.f32 %v2715_v51, %v390_v11 }
 0x18c   : > { %v1300_v25 = vpack.c.bf16 %v983_v5, %v814_v1  ;;  %1021 = vmatmul.bf16.gmra.mxu1 %v568_v61  ;;  %v527_v32 = vadd.f32 %v2725_v2, %v459_v59  ;;  %v901_v11 = vadd.f32 %v2612_v34, %v2502_v35 }
 0x18d   : > { %1427 = vst [vmem:[%s2514_s16 + $0x104] sm:$0xf] %v1299_v29  ;;  %1190 = vmatmul.bf16.gmra.mxu2 %v568_v61  ;;  %v526_v27 = vadd.f32 %v2725_v2, %v458_v9 }
 0x18e   : > { %1428 = vst [vmem:[%s2514_s16 + $0x108] sm:$0xff] %v1300_v25  ;;  %v1062_v12 = vpop.f32.mrf.mxu3 }
 0x18f   : > { %v1063_v46 = vadd.f32 %v1062_v12, %v2504_v15  ;;  %v569_v57 = vpack.c.bf16 %v526_v27, %v525_v60  ;;  %v904_v60 = vadd.f32 %v2622_v8, %v2502_v35 }
 0x190   : > { %v1151_v18 = vpop.f32.mrf.mxu2  ;;  %v815_v58 = vpop.f32.mrf.mxu0 }
 0x191   : > { %v1152_v20 = vadd.f32 %v1151_v18, %v2510_v23  ;;  %v1364_v52 = vpack.c.bf16 %v1063_v46, %v894_v14  ;;  %v816_v10 = vadd.f32 %v815_v58, %v2502_v35  ;;  %v984_v30 = vpop.f32.mrf.mxu1 }
 0x192   : > { %v985_v31 = vadd.f32 %v984_v30, %v2504_v15  ;;  %v393_v30 = vld [vmem:[%s2292_s18 + $0x160] sm:$0xff] }
 0x193   : > { %v1301_v26 = vpack.c.bf16 %v1152_v20, %v1152_v20  ;;  %1492 = vst [vmem:[%s2514_s16 + $0x288] sm:$0xff] %v1364_v52 }
 0x194   : > { %v1302_v33 = vpack.c.bf16 %v985_v31, %v816_v10 }
 0x195   : > { %1429 = vst [vmem:[%s2514_s16 + $0x110] sm:$0xf] %v1301_v26  ;;  %v394_v26 = vld [vmem:[%s2292_s18 + $0x168] sm:$0xff] }
 0x196   : > { %1430 = vst [vmem:[%s2514_s16 + $0x114] sm:$0xff] %v1302_v33  ;;  %v1064_v36 = vpop.f32.mrf.mxu3 }
 0x197   : > { %v1065_v37 = vadd.f32 %v1064_v36, %v2504_v15  ;;  %v461_v36 = vmul.f32 %v2715_v51, %v393_v30 }
 0x198   : > { %v1153_v38 = vpop.f32.mrf.mxu2  ;;  %v818_v40 = vpop.f32.mrf.mxu0 }
 0x199   : > { %v1154_v7 = vadd.f32 %v1153_v38, %v2510_v23  ;;  %v1366_v42 = vpack.c.bf16 %v1065_v37, %v896_v3  ;;  %v819_v44 = vadd.f32 %v818_v40, %v2502_v35  ;;  %v987_v47 = vpop.f32.mrf.mxu1  ;;  %v529_v8 = vadd.f32 %v2725_v2, %v461_v36 }
 0x19a   : > { %v988_v49 = vadd.f32 %v987_v47, %v2504_v15 }
 0x19b   : > { %v1303_v48 = vpack.c.bf16 %v1154_v7, %v1154_v7  ;;  %1494 = vst [vmem:[%s2514_s16 + $0x294] sm:$0xff] %v1366_v42  ;;  %857 = vmatmul.bf16.gmra.mxu0 %v569_v57  ;;  %1235 = vmatmul.bf16.gmra.mxu3 %v2445_v22  ;;  %v460_v22 = vmul.f32 %v2715_v51, %v392_v50 }
 0x19c   : > { %v1304_v13 = vpack.c.bf16 %v988_v49, %v819_v44  ;;  %1026 = vmatmul.bf16.gmra.mxu1 %v569_v57  ;;  %v906_v49 = vadd.f32 %v2633_v21, %v2502_v35 }
 0x19d   : > { %1431 = vst [vmem:[%s2514_s16 + $0x11c] sm:$0xf] %v1303_v48  ;;  %1195 = vmatmul.bf16.gmra.mxu2 %v569_v57  ;;  %v528_v5 = vadd.f32 %v2725_v2, %v460_v22 }
 0x19e   : > { %1432 = vst [vmem:[%s2514_s16 + $0x120] sm:$0xff] %v1304_v13  ;;  %v1067_v45 = vpop.f32.mrf.mxu3 }
 0x19f   : > { %v1068_v54 = vadd.f32 %v1067_v45, %v2504_v15  ;;  %v570_v46 = vpack.c.bf16 %v528_v5, %v527_v32 }
 0x1a0   : > { %v1156_v55 = vpop.f32.mrf.mxu2  ;;  %v820_v62 = vpop.f32.mrf.mxu0 }
 0x1a1   : > { %v1157_v61 = vadd.f32 %v1156_v55, %v2510_v23  ;;  %v1368_v0 = vpack.c.bf16 %v1068_v54, %v899_v43  ;;  %v821_v56 = vadd.f32 %v820_v62, %v2502_v35  ;;  %v989_v1 = vpop.f32.mrf.mxu1  ;;  %v395_v62 = vld [vmem:[%s2292_s18 + $0x170] sm:$0xff] }
 0x1a2   : > { %v990_v29 = vadd.f32 %v989_v1, %v2504_v15  ;;  %v909_v1 = vadd.f32 %v2643_v41, %v2502_v35  ;;  %v463_v32 = vmul.f32 %v2715_v51, %v395_v62 }
 0x1a3   : > { %v1305_v4 = vpack.c.bf16 %v1157_v61, %v1157_v61  ;;  %1496 = vst [vmem:[%s2514_s16 + $0x2a0] sm:$0xff] %v1368_v0  ;;  %v396_v0 = vld [vmem:[%s2292_s18 + $0x178] sm:$0xff] }
 0x1a4   : > { %v1306_v25 = vpack.c.bf16 %v990_v29, %v821_v56  ;;  %v531_v41 = vadd.f32 %v2725_v2, %v463_v32 }
 0x1a5   : > { %1433 = vst [vmem:[%s2514_s16 + $0x128] sm:$0xf] %v1305_v4 }
 0x1a6   : > { %1434 = vst [vmem:[%s2514_s16 + $0x12c] sm:$0xff] %v1306_v25  ;;  %v1069_v6 = vpop.f32.mrf.mxu3 }
 0x1a7   : > { %v1070_v12 = vadd.f32 %v1069_v6, %v2504_v15 }
 0x1a8   : > { %v1158_v14 = vpop.f32.mrf.mxu2  ;;  %v823_v28 = vpop.f32.mrf.mxu0 }
 0x1a9   : > { %v1159_v18 = vadd.f32 %v1158_v14, %v2510_v23  ;;  %v1370_v9 = vpack.c.bf16 %v1070_v12, %v901_v11  ;;  %v824_v20 = vadd.f32 %v823_v28, %v2502_v35  ;;  %v992_v58 = vpop.f32.mrf.mxu1 }
 0x1aa   : > { %v993_v10 = vadd.f32 %v992_v58, %v2504_v15 }
 0x1ab   : > { %v1307_v52 = vpack.c.bf16 %v1159_v18, %v1159_v18  ;;  %1498 = vst [vmem:[%s2514_s16 + $0x2ac] sm:$0xff] %v1370_v9  ;;  %862 = vmatmul.bf16.gmra.mxu0 %v570_v46  ;;  %1240 = vmatmul.bf16.gmra.mxu3 %v2460_v39  ;;  %v462_v39 = vmul.f32 %v2715_v51, %v394_v26 }
 0x1ac   : > { %v1308_v34 = vpack.c.bf16 %v993_v10, %v824_v20  ;;  %1031 = vmatmul.bf16.gmra.mxu1 %v570_v46  ;;  %v911_v9 = vadd.f32 %v2654_v63, %v2502_v35 }
 0x1ad   : > { %1435 = vst [vmem:[%s2514_s16 + $0x134] sm:$0xf] %v1307_v52  ;;  %1200 = vmatmul.bf16.gmra.mxu2 %v570_v46  ;;  %v530_v44 = vadd.f32 %v2725_v2, %v462_v39 }
 0x1ae   : > { %1436 = vst [vmem:[%s2514_s16 + $0x138] sm:$0xff] %v1308_v34  ;;  %v1072_v31 = vpop.f32.mrf.mxu3 }
 0x1af   : > { %v1073_v27 = vadd.f32 %v1072_v31, %v2504_v15  ;;  %v571_v50 = vpack.c.bf16 %v530_v44, %v529_v8  ;;  %v916_v8 = vadd.f32 %v2675_v16, %v2502_v35 }
 0x1b0   : > { %v1161_v33 = vpop.f32.mrf.mxu2  ;;  %v825_v37 = vpop.f32.mrf.mxu0 }
 0x1b1   : > { %v1162_v3 = vadd.f32 %v1161_v33, %v2510_v23  ;;  %v1372_v38 = vpack.c.bf16 %v1073_v27, %v904_v60  ;;  %v826_v57 = vadd.f32 %v825_v37, %v2502_v35  ;;  %v994_v7 = vpop.f32.mrf.mxu1  ;;  %v914_v33 = vadd.f32 %v2664_v19, %v2502_v35 }
 0x1b2   : > { %v995_v42 = vadd.f32 %v994_v7, %v2504_v15 }
 0x1b3   : > { %v1309_v40 = vpack.c.bf16 %v1162_v3, %v1162_v3  ;;  %1500 = vst [vmem:[%s2514_s16 + $0x2b8] sm:$0xff] %v1372_v38 }
 0x1b4   : > { %v1310_v47 = vpack.c.bf16 %v995_v42, %v826_v57 }
 0x1b5   : > { %1437 = vst [vmem:[%s2514_s16 + $0x140] sm:$0xf] %v1309_v40 }
 0x1b6   : > { %1438 = vst [vmem:[%s2514_s16 + $0x144] sm:$0xff] %v1310_v47  ;;  %v1074_v48 = vpop.f32.mrf.mxu3 }
 0x1b7   : > { %v1075_v13 = vadd.f32 %v1074_v48, %v2504_v15 }
 0x1b8   : > { %v1163_v24 = vpop.f32.mrf.mxu2  ;;  %v828_v43 = vpop.f32.mrf.mxu0 }
 0x1b9   : > { %v1164_v45 = vadd.f32 %v1163_v24, %v2510_v23  ;;  %v1374_v54 = vpack.c.bf16 %v1075_v13, %v906_v49  ;;  %v829_v55 = vadd.f32 %v828_v43, %v2502_v35  ;;  %v997_v59 = vpop.f32.mrf.mxu1 }
 0x1ba   : > { %v998_v61 = vadd.f32 %v997_v59, %v2504_v15 }
 0x1bb   : > { %v1311_v22 = vpack.c.bf16 %v1164_v45, %v1164_v45  ;;  %1502 = vst [vmem:[%s2514_s16 + $0x2c4] sm:$0xff] %v1374_v54  ;;  %867 = vmatmul.bf16.gmra.mxu0 %v571_v50  ;;  %1245 = vmatmul.bf16.gmra.mxu3 %v2475_v53  ;;  %v464_v53 = vmul.f32 %v2715_v51, %v396_v0 }
 0x1bc   : > { %v1312_v21 = vpack.c.bf16 %v998_v61, %v829_v55  ;;  %1036 = vmatmul.bf16.gmra.mxu1 %v571_v50 }
 0x1bd   : > { %1439 = vst [vmem:[%s2514_s16 + $0x14c] sm:$0xf] %v1311_v22  ;;  %1205 = vmatmul.bf16.gmra.mxu2 %v571_v50  ;;  %v532_v18 = vadd.f32 %v2725_v2, %v464_v53 }
 0x1be   : > { %1440 = vst [vmem:[%s2514_s16 + $0x150] sm:$0xff] %v1312_v21  ;;  %v1077_v56 = vpop.f32.mrf.mxu3 }
 0x1bf   : > { %v1078_v4 = vadd.f32 %v1077_v56, %v2504_v15  ;;  %v572_v52 = vpack.c.bf16 %v532_v18, %v531_v41 }
 0x1c0   : > { %v1166_v29 = vpop.f32.mrf.mxu2  ;;  %v830_v25 = vpop.f32.mrf.mxu0 }
 0x1c1   : > { %v1167_v5 = vadd.f32 %v1166_v29, %v2510_v23  ;;  %v1376_v6 = vpack.c.bf16 %v1078_v4, %v909_v1  ;;  %v831_v11 = vadd.f32 %v830_v25, %v2502_v35  ;;  %v999_v12 = vpop.f32.mrf.mxu1 }
 0x1c2   : > { %v1000_v46 = vadd.f32 %v999_v12, %v2504_v15 }
 0x1c3   : > { %v1313_v14 = vpack.c.bf16 %v1167_v5, %v1167_v5  ;;  %1504 = vst [vmem:[%s2514_s16 + $0x2d0] sm:$0xff] %v1376_v6 }
 0x1c4   : > { %v1314_v28 = vpack.c.bf16 %v1000_v46, %v831_v11 }
 0x1c5   : > { %1441 = vst [vmem:[%s2514_s16 + $0x158] sm:$0xf] %v1313_v14 }
 0x1c6   : > { %1442 = vst [vmem:[%s2514_s16 + $0x15c] sm:$0xff] %v1314_v28  ;;  %v1079_v51 = vpop.f32.mrf.mxu3 }
 0x1c7   : > { %v1080_v20 = vadd.f32 %v1079_v51, %v2504_v15 }
 0x1c8   : > { %v1168_v58 = vpop.f32.mrf.mxu2  ;;  %v833_v34 = vpop.f32.mrf.mxu0 }
 0x1c9   : > { %v1169_v10 = vadd.f32 %v1168_v58, %v2510_v23  ;;  %v1378_v30 = vpack.c.bf16 %v1080_v20, %v911_v9  ;;  %v834_v2 = vadd.f32 %v833_v34, %v2502_v35  ;;  %v1002_v26 = vpop.f32.mrf.mxu1 }
 0x1ca   : > { %v1003_v60 = vadd.f32 %v1002_v26, %v2504_v15 }
 0x1cb   : > { %v1315_v31 = vpack.c.bf16 %v1169_v10, %v1169_v10  ;;  %1506 = vst [vmem:[%s2514_s16 + $0x2dc] sm:$0xff] %v1378_v30  ;;  %872 = vmatmul.bf16.gmra.mxu0 %v572_v52  ;;  %1250 = vmatmul.bf16.gmra.mxu3 %v2490_v17 }
 0x1cc   : > { %v1316_v63 = vpack.c.bf16 %v1003_v60, %v834_v2  ;;  %1041 = vmatmul.bf16.gmra.mxu1 %v572_v52 }
 0x1cd   : > { %1443 = vst [vmem:[%s2514_s16 + $0x164] sm:$0xf] %v1315_v31  ;;  %1210 = vmatmul.bf16.gmra.mxu2 %v572_v52 }
 0x1ce   : > { %1444 = vst [vmem:[%s2514_s16 + $0x168] sm:$0xff] %v1316_v63  ;;  %v1082_v27 = vpop.f32.mrf.mxu3 }
 0x1cf   : > { %v1083_v36 = vadd.f32 %v1082_v27, %v2504_v15 }
 0x1d0   : > { %v1171_v39 = vpop.f32.mrf.mxu2  ;;  %v835_v37 = vpop.f32.mrf.mxu0 }
 0x1d1   : > { %v1172_v3 = vadd.f32 %v1171_v39, %v2510_v23  ;;  %v1380_v38 = vpack.c.bf16 %v1083_v36, %v914_v33  ;;  %v836_v17 = vadd.f32 %v835_v37, %v2502_v35  ;;  %v1004_v57 = vpop.f32.mrf.mxu1 }
 0x1d2   : > { %v1005_v40 = vadd.f32 %v1004_v57, %v2504_v15 }
 0x1d3   : > { %v1317_v7 = vpack.c.bf16 %v1172_v3, %v1172_v3  ;;  %1508 = vst [vmem:[%s2514_s16 + $0x2e8] sm:$0xff] %v1380_v38 }
 0x1d4   : > { %v1318_v42 = vpack.c.bf16 %v1005_v40, %v836_v17 }
 0x1d5   : > { %1445 = vst [vmem:[%s2514_s16 + $0x170] sm:$0xf] %v1317_v7 }
 0x1d6   : > { %1446 = vst [vmem:[%s2514_s16 + $0x174] sm:$0xff] %v1318_v42  ;;  %v1084_v19 = vpop.f32.mrf.mxu3 }
 0x1d7   : > { %v1085_v44 = vadd.f32 %v1084_v19, %v2504_v15 }
 0x1d8   : > { %v1173_v47 = vpop.f32.mrf.mxu2  ;;  %v838_v49 = vpop.f32.mrf.mxu0 }
 0x1d9   : > { %v1174_v48 = vadd.f32 %v1173_v47, %v2510_v23  ;;  %v1382_v13 = vpack.c.bf16 %v1085_v44, %v916_v8  ;;  %v839_v24 = vadd.f32 %v838_v49, %v2502_v35  ;;  %v1007_v50 = vpop.f32.mrf.mxu1 }
 0x1da   : > { %v1008_v43 = vadd.f32 %v1007_v50, %v2504_v15 }
 0x1db   : > { %v1319_v45 = vpack.c.bf16 %v1174_v48, %v1174_v48  ;;  %1510 = vst [vmem:[%s2514_s16 + $0x2f4] sm:$0xff] %v1382_v13 }
 0x1dc   : > { %v1320_v54 = vpack.c.bf16 %v1008_v43, %v839_v24 }
 0x1dd   : > { %1447 = vst [vmem:[%s2514_s16 + $0x17c] sm:$0xf] %v1319_v45 }
 0x1de   : > { %1448 = vst [vmem:[%s2514_s16 + $0x180] sm:$0xff] %v1320_v54  ;;  %v1216_v16 = vpop.f32.mrf.mxu3 }
 0x1df   : > { %v1217_v59 = vadd.f32 %v1216_v16, %v2510_v23 }
 0x1e0   : > { %v1176_v55 = vpop.f32.mrf.mxu2  ;;  %v840_v61 = vpop.f32.mrf.mxu0 }
 0x1e1   : > { %v1177_v22 = vadd.f32 %v1176_v55, %v2510_v23  ;;  %v1353_v21 = vpack.c.bf16 %v1217_v59, %v1217_v59  ;;  %v841_v62 = vadd.f32 %v840_v61, %v2502_v35  ;;  %v1009_v0 = vpop.f32.mrf.mxu1 }
 0x1e2   : > { %v1010_v1 = vadd.f32 %v1009_v0, %v2504_v15 }
 0x1e3   : > { %v1321_v56 = vpack.c.bf16 %v1177_v22, %v1177_v22  ;;  %1481 = vst [vmem:[%s2514_s16 + $0x248] sm:$0xf] %v1353_v21 }
 0x1e4   : > { %v1322_v4 = vpack.c.bf16 %v1010_v1, %v841_v62 }
 0x1e5   : > { %1449 = vst [vmem:[%s2514_s16 + $0x188] sm:$0xf] %v1321_v56 }
 0x1e6   : > { %1450 = vst [vmem:[%s2514_s16 + $0x18c] sm:$0xff] %v1322_v4  ;;  %v1218_v29 = vpop.f32.mrf.mxu3 }
 0x1e7   : > { %v1219_v53 = vadd.f32 %v1218_v29, %v2510_v23 }
 0x1e8   : > { %v1178_v32 = vpop.f32.mrf.mxu2  ;;  %v843_v25 = vpop.f32.mrf.mxu0 }
 0x1e9   : > { %v1179_v5 = vadd.f32 %v1178_v32, %v2510_v23  ;;  %v1355_v6 = vpack.c.bf16 %v1219_v53, %v1219_v53  ;;  %v844_v11 = vadd.f32 %v843_v25, %v2502_v35  ;;  %v1012_v12 = vpop.f32.mrf.mxu1 }
 0x1ea   : > { %v1013_v46 = vadd.f32 %v1012_v12, %v2504_v15 }
 0x1eb   : > { %v1323_v14 = vpack.c.bf16 %v1179_v5, %v1179_v5  ;;  %1483 = vst [vmem:[%s2514_s16 + $0x254] sm:$0xf] %v1355_v6 }
 0x1ec   : > { %v1324_v41 = vpack.c.bf16 %v1013_v46, %v844_v11 }
 0x1ed   : > { %1451 = vst [vmem:[%s2514_s16 + $0x194] sm:$0xf] %v1323_v14 }
 0x1ee   : > { %1452 = vst [vmem:[%s2514_s16 + $0x198] sm:$0xff] %v1324_v41  ;;  %v1221_v18 = vpop.f32.mrf.mxu3 }
 0x1ef   : > { %v1222_v51 = vadd.f32 %v1221_v18, %v2510_v23 }
 0x1f0   : > { %v1181_v28 = vpop.f32.mrf.mxu2  ;;  %v845_v20 = vpop.f32.mrf.mxu0 }
 0x1f1   : > { %v1182_v9 = vadd.f32 %v1181_v28, %v2510_v23  ;;  %v1357_v58 = vpack.c.bf16 %v1222_v51, %v1222_v51  ;;  %v846_v52 = vadd.f32 %v845_v20, %v2502_v35  ;;  %v1014_v10 = vpop.f32.mrf.mxu1 }
 0x1f2   : > { %v1015_v30 = vadd.f32 %v1014_v10, %v2504_v15 }
 0x1f3   : > { %v1325_v34 = vpack.c.bf16 %v1182_v9, %v1182_v9  ;;  %1485 = vst [vmem:[%s2514_s16 + $0x260] sm:$0xf] %v1357_v58 }
 0x1f4   : > { %v1326_v2 = vpack.c.bf16 %v1015_v30, %v846_v52 }
 0x1f5   : > { %1453 = vst [vmem:[%s2514_s16 + $0x1a0] sm:$0xf] %v1325_v34 }
 0x1f6   : > { %1454 = vst [vmem:[%s2514_s16 + $0x1a4] sm:$0xff] %v1326_v2  ;;  %v1223_v26 = vpop.f32.mrf.mxu3 }
 0x1f7   : > { %v1224_v60 = vadd.f32 %v1223_v26, %v2510_v23 }
 0x1f8   : > { %v1183_v31 = vpop.f32.mrf.mxu2  ;;  %v848_v27 = vpop.f32.mrf.mxu0 }
 0x1f9   : > { %v1184_v63 = vadd.f32 %v1183_v31, %v2510_v23  ;;  %v1359_v33 = vpack.c.bf16 %v1224_v60, %v1224_v60  ;;  %v849_v36 = vadd.f32 %v848_v27, %v2502_v35  ;;  %v1017_v39 = vpop.f32.mrf.mxu1 }
 0x1fa   : > { %v1018_v37 = vadd.f32 %v1017_v39, %v2504_v15 }
 0x1fb   : > { %v1327_v3 = vpack.c.bf16 %v1184_v63, %v1184_v63  ;;  %1487 = vst [vmem:[%s2514_s16 + $0x26c] sm:$0xf] %v1359_v33 }
 0x1fc   : > { %v1328_v38 = vpack.c.bf16 %v1018_v37, %v849_v36 }
 0x1fd   : > { %1455 = vst [vmem:[%s2514_s16 + $0x1ac] sm:$0xf] %v1327_v3 }
 0x1fe   : > { %1456 = vst [vmem:[%s2514_s16 + $0x1b0] sm:$0xff] %v1328_v38  ;;  %v1226_v17 = vpop.f32.mrf.mxu3 }
 0x1ff   : > { %v1227_v7 = vadd.f32 %v1226_v17, %v2510_v23 }
 0x200   : > { %v1186_v57 = vpop.f32.mrf.mxu2  ;;  %v850_v42 = vpop.f32.mrf.mxu0 }
 0x201   : > { %v1187_v40 = vadd.f32 %v1186_v57, %v2510_v23  ;;  %v1361_v19 = vpack.c.bf16 %v1227_v7, %v1227_v7  ;;  %v851_v8 = vadd.f32 %v850_v42, %v2502_v35  ;;  %v1019_v44 = vpop.f32.mrf.mxu1 }
 0x202   : > { %v1020_v48 = vadd.f32 %v1019_v44, %v2504_v15 }
 0x203   : > { %v1329_v47 = vpack.c.bf16 %v1187_v40, %v1187_v40  ;;  %1489 = vst [vmem:[%s2514_s16 + $0x278] sm:$0xf] %v1361_v19 }
 0x204   : > { %v1330_v49 = vpack.c.bf16 %v1020_v48, %v851_v8 }
 0x205   : > { %1457 = vst [vmem:[%s2514_s16 + $0x1b8] sm:$0xf] %v1329_v47 }
 0x206   : > { %1458 = vst [vmem:[%s2514_s16 + $0x1bc] sm:$0xff] %v1330_v49  ;;  %v1228_v13 = vpop.f32.mrf.mxu3 }
 0x207   : > { %v1229_v50 = vadd.f32 %v1228_v13, %v2510_v23 }
 0x208   : > { %v1188_v24 = vpop.f32.mrf.mxu2  ;;  %v853_v43 = vpop.f32.mrf.mxu0 }
 0x209   : > { %v1189_v45 = vadd.f32 %v1188_v24, %v2510_v23  ;;  %v1363_v54 = vpack.c.bf16 %v1229_v50, %v1229_v50  ;;  %v854_v16 = vadd.f32 %v853_v43, %v2502_v35  ;;  %v1022_v55 = vpop.f32.mrf.mxu1 }
 0x20a   : > { %v1023_v22 = vadd.f32 %v1022_v55, %v2504_v15 }
 0x20b   : > { %v1331_v59 = vpack.c.bf16 %v1189_v45, %v1189_v45  ;;  %1491 = vst [vmem:[%s2514_s16 + $0x284] sm:$0xf] %v1363_v54 }
 0x20c   : > { %v1332_v61 = vpack.c.bf16 %v1023_v22, %v854_v16 }
 0x20d   : > { %1459 = vst [vmem:[%s2514_s16 + $0x1c4] sm:$0xf] %v1331_v59 }
 0x20e   : > { %1460 = vst [vmem:[%s2514_s16 + $0x1c8] sm:$0xff] %v1332_v61  ;;  %v1231_v21 = vpop.f32.mrf.mxu3 }
 0x20f   : > { %v1232_v0 = vadd.f32 %v1231_v21, %v2510_v23 }
 0x210   : > { %v1191_v62 = vpop.f32.mrf.mxu2  ;;  %v855_v1 = vpop.f32.mrf.mxu0 }
 0x211   : > { %v1192_v56 = vadd.f32 %v1191_v62, %v2510_v23  ;;  %v1365_v4 = vpack.c.bf16 %v1232_v0, %v1232_v0  ;;  %v856_v29 = vadd.f32 %v855_v1, %v2502_v35  ;;  %v1024_v32 = vpop.f32.mrf.mxu1 }
 0x212   : > { %v1025_v5 = vadd.f32 %v1024_v32, %v2504_v15 }
 0x213   : > { %v1333_v53 = vpack.c.bf16 %v1192_v56, %v1192_v56  ;;  %1493 = vst [vmem:[%s2514_s16 + $0x290] sm:$0xf] %v1365_v4 }
 0x214   : > { %v1334_v25 = vpack.c.bf16 %v1025_v5, %v856_v29 }
 0x215   : > { %1461 = vst [vmem:[%s2514_s16 + $0x1d0] sm:$0xf] %v1333_v53 }
 0x216   : > { %1462 = vst [vmem:[%s2514_s16 + $0x1d4] sm:$0xff] %v1334_v25  ;;  %v1233_v6 = vpop.f32.mrf.mxu3 }
 0x217   : > { %v1234_v12 = vadd.f32 %v1233_v6, %v2510_v23 }
 0x218   : > { %v1193_v11 = vpop.f32.mrf.mxu2  ;;  %v858_v46 = vpop.f32.mrf.mxu0 }
 0x219   : > { %v1194_v14 = vadd.f32 %v1193_v11, %v2510_v23  ;;  %v1367_v41 = vpack.c.bf16 %v1234_v12, %v1234_v12  ;;  %v859_v18 = vadd.f32 %v858_v46, %v2502_v35  ;;  %v1027_v28 = vpop.f32.mrf.mxu1 }
 0x21a   : > { %v1028_v9 = vadd.f32 %v1027_v28, %v2504_v15 }
 0x21b   : > { %v1335_v51 = vpack.c.bf16 %v1194_v14, %v1194_v14  ;;  %1495 = vst [vmem:[%s2514_s16 + $0x29c] sm:$0xf] %v1367_v41 }
 0x21c   : > { %v1336_v20 = vpack.c.bf16 %v1028_v9, %v859_v18 }
 0x21d   : > { %1463 = vst [vmem:[%s2514_s16 + $0x1dc] sm:$0xf] %v1335_v51 }
 0x21e   : > { %1464 = vst [vmem:[%s2514_s16 + $0x1e0] sm:$0xff] %v1336_v20  ;;  %v1236_v58 = vpop.f32.mrf.mxu3 }
 0x21f   : > { %v1237_v10 = vadd.f32 %v1236_v58, %v2510_v23 }
 0x220   : > { %v1196_v52 = vpop.f32.mrf.mxu2  ;;  %v860_v30 = vpop.f32.mrf.mxu0 }
 0x221   : > { %v1197_v34 = vadd.f32 %v1196_v52, %v2510_v23  ;;  %v1369_v2 = vpack.c.bf16 %v1237_v10, %v1237_v10  ;;  %v861_v26 = vadd.f32 %v860_v30, %v2502_v35  ;;  %v1029_v31 = vpop.f32.mrf.mxu1 }
 0x222   : > { %v1030_v63 = vadd.f32 %v1029_v31, %v2504_v15 }
 0x223   : > { %v1337_v60 = vpack.c.bf16 %v1197_v34, %v1197_v34  ;;  %1497 = vst [vmem:[%s2514_s16 + $0x2a8] sm:$0xf] %v1369_v2 }
 0x224   : > { %v1338_v27 = vpack.c.bf16 %v1030_v63, %v861_v26 }
 0x225   : > { %1465 = vst [vmem:[%s2514_s16 + $0x1e8] sm:$0xf] %v1337_v60 }
 0x226   : > { %1466 = vst [vmem:[%s2514_s16 + $0x1ec] sm:$0xff] %v1338_v27  ;;  %v1238_v33 = vpop.f32.mrf.mxu3 }
 0x227   : > { %v1239_v39 = vadd.f32 %v1238_v33, %v2510_v23 }
 0x228   : > { %v1198_v36 = vpop.f32.mrf.mxu2  ;;  %v863_v37 = vpop.f32.mrf.mxu0 }
 0x229   : > { %v1199_v3 = vadd.f32 %v1198_v36, %v2510_v23  ;;  %v1371_v38 = vpack.c.bf16 %v1239_v39, %v1239_v39  ;;  %v864_v17 = vadd.f32 %v863_v37, %v2502_v35  ;;  %v1032_v57 = vpop.f32.mrf.mxu1 }
 0x22a   : > { %v1033_v40 = vadd.f32 %v1032_v57, %v2504_v15 }
 0x22b   : > { %v1339_v7 = vpack.c.bf16 %v1199_v3, %v1199_v3  ;;  %1499 = vst [vmem:[%s2514_s16 + $0x2b4] sm:$0xf] %v1371_v38 }
 0x22c   : > { %v1340_v42 = vpack.c.bf16 %v1033_v40, %v864_v17 }
 0x22d   : > { %1467 = vst [vmem:[%s2514_s16 + $0x1f4] sm:$0xf] %v1339_v7 }
 0x22e   : > { %1468 = vst [vmem:[%s2514_s16 + $0x1f8] sm:$0xff] %v1340_v42  ;;  %v1241_v19 = vpop.f32.mrf.mxu3 }
 0x22f   : > { %v1242_v44 = vadd.f32 %v1241_v19, %v2510_v23 }
 0x230   : > { %v1201_v8 = vpop.f32.mrf.mxu2  ;;  %v865_v48 = vpop.f32.mrf.mxu0 }
 0x231   : > { %v1202_v47 = vadd.f32 %v1201_v8, %v2510_v23  ;;  %v1373_v49 = vpack.c.bf16 %v1242_v44, %v1242_v44  ;;  %v866_v13 = vadd.f32 %v865_v48, %v2502_v35  ;;  %v1034_v24 = vpop.f32.mrf.mxu1 }
 0x232   : > { %v1035_v45 = vadd.f32 %v1034_v24, %v2504_v15 }
 0x233   : > { %v1341_v50 = vpack.c.bf16 %v1202_v47, %v1202_v47  ;;  %1501 = vst [vmem:[%s2514_s16 + $0x2c0] sm:$0xf] %v1373_v49 }
 0x234   : > { %v1342_v43 = vpack.c.bf16 %v1035_v45, %v866_v13 }
 0x235   : > { %1469 = vst [vmem:[%s2514_s16 + $0x200] sm:$0xf] %v1341_v50 }
 0x236   : > { %1470 = vst [vmem:[%s2514_s16 + $0x204] sm:$0xff] %v1342_v43  ;;  %v1243_v54 = vpop.f32.mrf.mxu3 }
 0x237   : > { %v1244_v55 = vadd.f32 %v1243_v54, %v2510_v23 }
 0x238   : > { %v1203_v16 = vpop.f32.mrf.mxu2  ;;  %v868_v22 = vpop.f32.mrf.mxu0 }
 0x239   : > { %v1204_v59 = vadd.f32 %v1203_v16, %v2510_v23  ;;  %v1375_v61 = vpack.c.bf16 %v1244_v55, %v1244_v55  ;;  %v869_v21 = vadd.f32 %v868_v22, %v2502_v35  ;;  %v1037_v62 = vpop.f32.mrf.mxu1 }
 0x23a   : > { %v1038_v56 = vadd.f32 %v1037_v62, %v2504_v15 }
 0x23b   : > { %v1343_v0 = vpack.c.bf16 %v1204_v59, %v1204_v59  ;;  %1503 = vst [vmem:[%s2514_s16 + $0x2cc] sm:$0xf] %v1375_v61 }
 0x23c   : > { %v1344_v1 = vpack.c.bf16 %v1038_v56, %v869_v21 }
 0x23d   : > { %1471 = vst [vmem:[%s2514_s16 + $0x20c] sm:$0xf] %v1343_v0 }
 0x23e   : > { %1472 = vst [vmem:[%s2514_s16 + $0x210] sm:$0xff] %v1344_v1  ;;  %v1246_v4 = vpop.f32.mrf.mxu3 }
 0x23f   : > { %v1247_v32 = vadd.f32 %v1246_v4, %v2510_v23 }
 0x240   : > { %v1206_v29 = vpop.f32.mrf.mxu2  ;;  %v870_v5 = vpop.f32.mrf.mxu0 }
 0x241   : > { %v1207_v53 = vadd.f32 %v1206_v29, %v2510_v23  ;;  %v1377_v25 = vpack.c.bf16 %v1247_v32, %v1247_v32  ;;  %v871_v6 = vadd.f32 %v870_v5, %v2502_v35  ;;  %v1039_v11 = vpop.f32.mrf.mxu1 }
 0x242   : > { %v1040_v14 = vadd.f32 %v1039_v11, %v2504_v15 }
 0x243   : > { %v1345_v12 = vpack.c.bf16 %v1207_v53, %v1207_v53  ;;  %1505 = vst [vmem:[%s2514_s16 + $0x2d8] sm:$0xf] %v1377_v25 }
 0x244   : > { %v1346_v46 = vpack.c.bf16 %v1040_v14, %v871_v6 }
 0x245   : > { %1473 = vst [vmem:[%s2514_s16 + $0x218] sm:$0xf] %v1345_v12 }
 0x246   : > { %1474 = vst [vmem:[%s2514_s16 + $0x21c] sm:$0xff] %v1346_v46  ;;  %v1248_v41 = vpop.f32.mrf.mxu3 }
 0x247   : > { %v1249_v28 = vadd.f32 %v1248_v41, %v2510_v23 }
 0x248   : > { %v1208_v18 = vpop.f32.mrf.mxu2  ;;  %v873_v9 = vpop.f32.mrf.mxu0 }
 0x249   : > { %v1209_v51 = vadd.f32 %v1208_v18, %v2510_v23  ;;  %v1379_v20 = vpack.c.bf16 %v1249_v28, %v1249_v28  ;;  %v874_v58 = vadd.f32 %v873_v9, %v2502_v35  ;;  %v1042_v52 = vpop.f32.mrf.mxu1 }
 0x24a   : > { %v1043_v34 = vadd.f32 %v1042_v52, %v2504_v15 }
 0x24b   : > { %v1347_v10 = vpack.c.bf16 %v1209_v51, %v1209_v51  ;;  %1507 = vst [vmem:[%s2514_s16 + $0x2e4] sm:$0xf] %v1379_v20 }
 0x24c   : > { %v1348_v30 = vpack.c.bf16 %v1043_v34, %v874_v58 }
 0x24d   : > { %1475 = vst [vmem:[%s2514_s16 + $0x224] sm:$0xf] %v1347_v10 }
 0x24e   : > { %1476 = vst [vmem:[%s2514_s16 + $0x228] sm:$0xff] %v1348_v30  ;;  %v1251_v2 = vpop.f32.mrf.mxu3 }
 0x24f   : > { %v1252_v31 = vadd.f32 %v1251_v2, %v2510_v23 }
 0x250   : > { %v1211_v26 = vpop.f32.mrf.mxu2  ;;  %v875_v63 = vpop.f32.mrf.mxu0 }
 0x251   : > { %v1212_v60 = vadd.f32 %v1211_v26, %v2510_v23  ;;  %v1381_v27 = vpack.c.bf16 %v1252_v31, %v1252_v31  ;;  %v876_v33 = vadd.f32 %v875_v63, %v2502_v35  ;;  %v1044_v36 = vpop.f32.mrf.mxu1 }
 0x252   : > { %v1045_v3 = vadd.f32 %v1044_v36, %v2504_v15 }
 0x253   : > { %v1349_v39 = vpack.c.bf16 %v1212_v60, %v1212_v60  ;;  %1509 = vst [vmem:[%s2514_s16 + $0x2f0] sm:$0xf] %v1381_v27 }
 0x254   : > { %v1350_v37 = vpack.c.bf16 %v1045_v3, %v876_v33 }
 0x255   : > { %1477 = vst [vmem:[%s2514_s16 + $0x230] sm:$0xf] %v1349_v39 }
 0x256   : > { %1478 = vst [vmem:[%s2514_s16 + $0x234] sm:$0xff] %v1350_v37  ;;  %v1253_v38 = vpop.f32.mrf.mxu3 }
 0x257   : > { %v1254_v17 = vadd.f32 %v1253_v38, %v2510_v23 }
 0x258   : > { %v1213_v35 = vpop.f32.mrf.mxu2 }
 0x259   : > { %v1214_v15 = vadd.f32 %v1213_v35, %v2510_v23  ;;  %v1383_v57 = vpack.c.bf16 %v1254_v17, %v1254_v17 }
 0x25b   : > { %v1351_v7 = vpack.c.bf16 %v1214_v15, %v1214_v15  ;;  %1511 = vst [vmem:[%s2514_s16 + $0x2fc] sm:$0xf] %v1383_v57 }
 0x25d   : > { %1479 = vst [vmem:[%s2514_s16 + $0x23c] sm:$0xf] %v1351_v7 }
 0x25e   : > { %2064 = shalt.err (!%p2061_p1)
}
 0x25f   : > { %s2134_s1 = smov 192   ;;  %s2135_s18 = smov 12  }
 0x260   : > { %1834 = dma.vmem_to_hbm [thread:$0]  (%p2212_p8), %s1529_s21, 12288, %s1531_s25, %s1513_s27, %s2134_s1, %s2134_s1, %s2135_s18  }
 0x261 PF: > { %s3059_s23 = sld [smem:[#allocation15_spill]]  ;;  %p1851_p2 = pnand %p1667_p10, %p2219_p9 }
 0x262   : > { %s3061_s30 = sld [smem:[#allocation17_spill]] }
 0x263   : > { %p1852_p4 = pneg %p1851_p2 }
 0x267   : > { %s1545_s6 = sand.u32 1, %s3059_s23  }
 0x268   : > { %s1546_s24 = scalar_lea.sflag [#allocation4], %s1545_s6 }
 0x269   : > { %2102 = dma.done.wait (%p1852_p4), %s1546_s24, 12288  }
 0x26a   : > { %2104 = vsyncadd (%p1852_p4), %s1546_s24, 4294955008  ;;  %s25_s23 = sadd.s32 1, %s3061_s30   ;;  %s3062_s7 = sld [smem:[#allocation16_spill]] }
 0x26b   : > { %p22_p5 = scmp.ge.s32.totalorder %s25_s23, 4   ;;  %s3063_s20 = sld [smem:[#allocation20_spill]] }
 0x26c   : > { %s3064_s29 = sld [smem:[#allocation18_spill]]  ;;  %s3065_s18 = smov %s2111_s19 }
 0x26d   : > { %s3067_s21 = smov %s2123_s22 }
 0x26e   :  { %24 = sbr.rel (!%p22_p5) target bundleno = 12 (0xc), region = 113 }
 0x270   : > { %s3066_s19 = smov %s3062_s7 }
 0x272   : > { %s3068_s22 = smov %s3064_s29 }
 0x273   :  { %1552 = vsyncpa [#allocation3], 1 }
 0x274   :  { %1554 = vsyncpa [#allocation3 + $0x1], 1 }
 0x275   :  { %1555 = vsyncpa [#allocation6], 1 }
 0x276   :  { %1557 = vsyncpa [#allocation6 + $0x1], 1 }
 0x277   :  { %1558 = vsyncpa [#allocation9], 1 }
 0x278   :  { %1559 = vsyncpa [#allocation4], 1 }
 0x279   :  { %1561 = vsyncpa [#allocation4 + $0x1], 1 }

</bundles_post_ra>
